<compile_context>
chip_gen: v6e
topology: v6e:2x2x1
jax: 0.10.0
libtpu: 0.0.40
codegen_flags: <defaults>
</compile_context>

<pallas_src>
import functools
import math

import jax
import jax.numpy as jnp
from jax.experimental import pallas as pl
from jax.experimental.pallas import tpu as pltpu


# ------------------------------ small helpers --------------------------------

def _bf16(x):
    return x.astype(jnp.bfloat16)


def _ln(x, g, b):
    mean = jnp.mean(x, axis=-1, keepdims=True)
    var = jnp.mean((x - mean) ** 2, axis=-1, keepdims=True)
    return (x - mean) * jax.lax.rsqrt(var + 1e-5) * g + b


def _pick_row_tile(R, target):
    """Largest multiple-of-8 divisor of R that is <= target (else R)."""
    if R <= target:
        return R
    t = (target // 8) * 8
    while t >= 8:
        if R % t == 0:
            return t
        t -= 8
    return R


# --------------------------- K1: self-attention block ------------------------

def _self_attn_kernel(x_ref, pos_ref, wqk_ref, bqk_ref, wv_ref, bv_ref,
                      wo_ref, bo_ref, g_ref, b_ref, o_ref, *, nh):
    x = x_ref[...][0]                                     # (nq, d) f32, one batch
    d = x.shape[1]
    dh = d // nh

    qk_in = x + pos_ref[...][0]
    # 1/sqrt(dh) already folded into the Q half of wqk/bqk by the wrapper.
    qk = jnp.dot(_bf16(qk_in), wqk_ref[...],
                 preferred_element_type=jnp.float32) + bqk_ref[...]     # (nq, 2d)
    v = jnp.dot(_bf16(x), wv_ref[...],
                preferred_element_type=jnp.float32) + bv_ref[...]       # (nq, d)

    heads = []
    for h in range(nh):
        qh = qk[:, h * dh:(h + 1) * dh]
        kh = qk[:, d + h * dh:d + (h + 1) * dh]
        vh = v[:, h * dh:(h + 1) * dh]
        # contract last dims directly: no explicit k transpose, no (nq,nq) scale mul
        s = jax.lax.dot_general(_bf16(qh), _bf16(kh), (((1,), (1,)), ((), ())),
                                preferred_element_type=jnp.float32)
        s = s - jnp.max(s, axis=-1, keepdims=True)
        p = jnp.exp(s)
        p = p * pl.reciprocal(jnp.sum(p, axis=-1, keepdims=True), approx=True)
        heads.append(jnp.dot(_bf16(p), _bf16(vh),
                             preferred_element_type=jnp.float32))
    attn = jnp.concatenate(heads, axis=-1)                # (nq, d) lane concat (XLU)
    out = jnp.dot(_bf16(attn), wo_ref[...],
                  preferred_element_type=jnp.float32) + bo_ref[...]     # one K=d matmul

    y = _ln(x + out, g_ref[...], b_ref[...])              # residual + norm2 fused
    o_ref[...] = y[None].astype(o_ref.dtype)


def pallas_self_attn_block(x, pos, w_qk, b_qk, w_v, b_v, w_o, b_o, g, b, *, nh):
    bs, nq, d = x.shape
    dh = d // nh
    scale = 1.0 / math.sqrt(dh)
    # fold attention scale into the Q half of the fused QK projection (trace time)
    qk_scale = jnp.concatenate([jnp.full((1, d), scale, jnp.float32),
                                jnp.ones((1, d), jnp.float32)], axis=-1)
    w_qk_s = _bf16(w_qk * qk_scale)
    b_qk_s = b_qk * qk_scale
    return pl.pallas_call(
        functools.partial(_self_attn_kernel, nh=nh),
        out_shape=jax.ShapeDtypeStruct((bs, nq, d), jnp.float32),
        grid=(bs,),
        in_specs=[pl.BlockSpec((1, nq, d), lambda i: (i, 0, 0)),
                  pl.BlockSpec((1, nq, d), lambda i: (i, 0, 0)),
                  pl.BlockSpec((d, 2 * d), lambda i: (0, 0)),
                  pl.BlockSpec((1, 2 * d), lambda i: (0, 0)),
                  pl.BlockSpec((d, d), lambda i: (0, 0)),
                  pl.BlockSpec((1, d), lambda i: (0, 0)),
                  pl.BlockSpec((d, d), lambda i: (0, 0)),
                  pl.BlockSpec((1, d), lambda i: (0, 0)),
                  pl.BlockSpec((1, d), lambda i: (0, 0)),
                  pl.BlockSpec((1, d), lambda i: (0, 0))],
        out_specs=pl.BlockSpec((1, nq, d), lambda i: (i, 0, 0)),
        compiler_params=pltpu.CompilerParams(dimension_semantics=("parallel",)),
    )(x, pos, w_qk_s, b_qk_s, _bf16(w_v), b_v, _bf16(w_o), b_o, g, b)


# --------------------- K2: row-tiled linear (value projection) ---------------

def _linear_kernel(x_ref, w_ref, b_ref, o_ref):
    o_ref[...] = (jnp.dot(_bf16(x_ref[...]), w_ref[...],
                          preferred_element_type=jnp.float32)
                  + b_ref[...]).astype(o_ref.dtype)


def pallas_linear_rows(x, w, b, *, out_dtype=jnp.float32, max_tile=1024):
    R, din = x.shape
    dout = w.shape[1]
    tile = _pick_row_tile(R, max_tile)
    return pl.pallas_call(
        _linear_kernel,
        out_shape=jax.ShapeDtypeStruct((R, dout), out_dtype),
        grid=(R // tile,),
        in_specs=[pl.BlockSpec((tile, din), lambda i: (i, 0)),
                  pl.BlockSpec((din, dout), lambda i: (0, 0)),
                  pl.BlockSpec((1, dout), lambda i: (0, 0))],
        out_specs=pl.BlockSpec((tile, dout), lambda i: (i, 0)),
        compiler_params=pltpu.CompilerParams(dimension_semantics=("parallel",)),
    )(x, _bf16(w), b)


# ------------- K3: fused sampling-offsets + attention-weight softmax ---------

def _sampling_params_kernel(x_ref, pos_ref, w_ref, b_ref, m_ref, o_ref, *, noff):
    q = x_ref[...] + pos_ref[...]                         # (tile, D)
    out = jnp.dot(_bf16(q), w_ref[...],
                  preferred_element_type=jnp.float32) + b_ref[...]      # (tile, 3*naw)
    off = out[:, :noff]
    aw_raw = out[:, noff:]
    # per-head softmax over (n_levels * n_points); subtracting the global row max
    # is softmax-invariant per group and keeps exp() stable.
    mx = jnp.max(aw_raw, axis=-1, keepdims=True)
    e = jnp.exp(aw_raw - mx)
    denom = jnp.dot(e, m_ref[...], preferred_element_type=jnp.float32)  # block-diag head mask
    aw = e * pl.reciprocal(denom, approx=True)
    # single lane-dense combined store (offsets ++ weights), split in the wrapper
    o_ref[...] = jnp.concatenate([off, aw], axis=-1).astype(o_ref.dtype)


def pallas_sampling_params(x, pos, w, b, *, nh, nl, npnt, max_tile=512):
    R, d = x.shape
    naw = nh * nl * npnt
    noff = 2 * naw
    tot = noff + naw
    tile = _pick_row_tile(R, max_tile)
    head = jnp.repeat(jnp.arange(nh, dtype=jnp.int32), nl * npnt)
    m = (head[:, None] == head[None, :]).astype(jnp.float32)            # (naw, naw)
    out = pl.pallas_call(
        functools.partial(_sampling_params_kernel, noff=noff),
        out_shape=jax.ShapeDtypeStruct((R, tot), jnp.float32),
        grid=(R // tile,),
        in_specs=[pl.BlockSpec((tile, d), lambda i: (i, 0)),
                  pl.BlockSpec((tile, d), lambda i: (i, 0)),
                  pl.BlockSpec((d, tot), lambda i: (0, 0)),
                  pl.BlockSpec((1, tot), lambda i: (0, 0)),
                  pl.BlockSpec((naw, naw), lambda i: (0, 0))],
        out_specs=pl.BlockSpec((tile, tot), lambda i: (i, 0)),
        compiler_params=pltpu.CompilerParams(dimension_semantics=("parallel",)),
    )(x, pos, _bf16(w), b, m)
    return out[:, :noff], out[:, noff:]


# ------------- K4: cross output-proj + norm1 + FFN + norm3 (fused) -----------

def _cross_out_ffn_kernel(x_ref, ca_ref, wo_ref, bo_ref, g1_ref, b1_ref,
                          w1_ref, c1_ref, w2_ref, c2_ref, g3_ref, b3_ref, o_ref):
    x = x_ref[...]
    co = jnp.dot(_bf16(ca_ref[...]), wo_ref[...],
                 preferred_element_type=jnp.float32) + bo_ref[...]
    y = _ln(x + co, g1_ref[...], b1_ref[...])             # residual + norm1
    h = jnp.dot(_bf16(y), w1_ref[...],
                preferred_element_type=jnp.float32) + c1_ref[...]
    h = jnp.maximum(h, 0.0)                               # ReLU
    f = jnp.dot(_bf16(h), w2_ref[...],
                preferred_element_type=jnp.float32) + c2_ref[...]
    z = _ln(y + f, g3_ref[...], b3_ref[...])              # residual + norm3
    o_ref[...] = z.astype(o_ref.dtype)


def pallas_cross_out_ffn(x, ca, wo, bo, g1, b1, w1, c1, w2, c2, g3, b3, *, max_tile=256):
    R, d = x.shape
    dff = w1.shape[1]
    tile = _pick_row_tile(R, max_tile)
    return pl.pallas_call(
        _cross_out_ffn_kernel,
        out_shape=jax.ShapeDtypeStruct((R, d), jnp.float32),
        grid=(R // tile,),
        in_specs=[pl.BlockSpec((tile, d), lambda i: (i, 0)),
                  pl.BlockSpec((tile, d), lambda i: (i, 0)),
                  pl.BlockSpec((d, d), lambda i: (0, 0)),
                  pl.BlockSpec((1, d), lambda i: (0, 0)),
                  pl.BlockSpec((1, d), lambda i: (0, 0)),
                  pl.BlockSpec((1, d), lambda i: (0, 0)),
                  pl.BlockSpec((d, dff), lambda i: (0, 0)),
                  pl.BlockSpec((1, dff), lambda i: (0, 0)),
                  pl.BlockSpec((dff, d), lambda i: (0, 0)),
                  pl.BlockSpec((1, d), lambda i: (0, 0)),
                  pl.BlockSpec((1, d), lambda i: (0, 0)),
                  pl.BlockSpec((1, d), lambda i: (0, 0))],
        out_specs=pl.BlockSpec((tile, d), lambda i: (i, 0)),
        compiler_params=pltpu.CompilerParams(dimension_semantics=("parallel",)),
    )(x, ca, _bf16(wo), bo, g1, b1, _bf16(w1), c1, _bf16(w2), c2, g3, b3)


# --------------- MSDeformAttn bilinear sampling (plain-JAX glue) -------------

def ms_deform_sample(value_rows, loc, aw, spatial_shapes, level_start_index,
                     *, bs, hw, nh, dh):
    # value_rows: (bs*hw, nh*dh) batch-major rows (value_proj output, bf16)
    # loc       : (bs, nq, nh, nl, np, 2) sampling locations in normalized [0,1]
    # aw        : (bs, nq, nh, nl, np) softmaxed attention weights
    # TODO(synk): this data-dependent per-pixel bilinear gather is kept as XLA glue;
    # a manual-DMA Pallas gather (P2+P4) is the remaining structural optimization.
    nq = loc.shape[1]
    npnt = loc.shape[4]
    value = value_rows.reshape(bs, hw, nh, dh).transpose(0, 2, 1, 3)  # (bs, nh, hw, dh)
    acc = jnp.zeros((bs, nh, nq, dh), jnp.float32)
    for lid, (H, W) in enumerate(spatial_shapes):
        start = level_start_index[lid]
        v_l = value[:, :, start:start + H * W, :]                     # (bs, nh, H*W, dh)
        loc_l = loc[:, :, :, lid]                                     # (bs, nq, nh, np, 2)
        aw_l = aw[:, :, :, lid]                                       # (bs, nq, nh, np)
        # grid_sample(align_corners=False): pixel coords = loc * size - 0.5
        ix = loc_l[..., 0] * W - 0.5
        iy = loc_l[..., 1] * H - 0.5
        x0 = jnp.floor(ix)
        y0 = jnp.floor(iy)
        fx = ix - x0
        fy = iy - y0
        sampled = jnp.zeros((bs, nq, nh, npnt, dh), jnp.float32)
        for dy in (0, 1):
            for dx in (0, 1):
                xi = x0 + dx
                yi = y0 + dy
                wgt = (fx if dx else 1.0 - fx) * (fy if dy else 1.0 - fy)
                valid = ((xi >= 0) & (xi <= W - 1) & (yi >= 0) & (yi <= H - 1))
                idx = (jnp.clip(yi, 0, H - 1) * W
                       + jnp.clip(xi, 0, W - 1)).astype(jnp.int32)    # (bs, nq, nh, np)
                idx_g = jnp.transpose(idx, (0, 2, 1, 3)).reshape(bs, nh, nq * npnt, 1)
                idx_g = jnp.broadcast_to(idx_g, (bs, nh, nq * npnt, dh))
                g = jnp.take_along_axis(v_l, idx_g, axis=2)           # (bs, nh, nq*np, dh)
                g = g.reshape(bs, nh, nq, npnt, dh).transpose(0, 2, 1, 3, 4)
                sampled = sampled + g.astype(jnp.float32) * (
                    wgt * valid.astype(jnp.float32))[..., None]
        acc = acc + jnp.einsum('bqhp,bqhpd->bhqd', aw_l, sampled)
    out = acc.transpose(0, 2, 1, 3).reshape(bs, nq, nh * dh)
    return out.reshape(bs * nq, nh * dh)


# ------------------------------- layer forward --------------------------------

def deformable_decoder_layer_forward(params, tgt, query_pos, reference_points,
                                     memory, *, n_heads, n_levels, n_points,
                                     spatial_shapes, level_start_index):
    # tgt, query_pos : (nq, bs, d)   reference_points : (nq, bs, n_levels, 4)
    # memory         : (hw, bs, d)
    nq, bs, d = tgt.shape
    hw = memory.shape[0]
    dh = d // n_heads

    tgt_b = jnp.transpose(tgt, (1, 0, 2))                             # (bs, nq, d)
    pos_b = jnp.transpose(query_pos, (1, 0, 2))
    mem_r = jnp.transpose(memory, (1, 0, 2)).reshape(bs * hw, d)
    ref_bm = jnp.transpose(reference_points, (1, 0, 2, 3))            # (bs, nq, nl, 4)

    # --- self-attention sub-layer (fused, K1; per-batch grid, no dense mask) ---
    sa = params['self_attn']
    tgt_b = pallas_self_attn_block(
        tgt_b, pos_b, sa['w_qk'], sa['b_qk'], sa['w_v'], sa['b_v'],
        sa['w_o'], sa['b_o'], params['norm2']['g'], params['norm2']['b'],
        nh=n_heads)

    tgt_r = tgt_b.reshape(bs * nq, d)
    pos_r = pos_b.reshape(bs * nq, d)

    # --- MSDeformAttn cross-attention ---
    ca = params['cross_attn']
    value_r = pallas_linear_rows(mem_r, ca['w_value'], ca['b_value'],
                                 out_dtype=jnp.bfloat16)              # K2 (bf16 out)
    off_r, aw_r = pallas_sampling_params(tgt_r, pos_r, ca['w_samp'], ca['b_samp'],
                                         nh=n_heads, nl=n_levels, npnt=n_points)  # K3
    off = off_r.reshape(bs, nq, n_heads, n_levels, n_points, 2)
    aw = aw_r.reshape(bs, nq, n_heads, n_levels, n_points)
    loc = (ref_bm[:, :, None, :, None, :2]
           + off / n_points * ref_bm[:, :, None, :, None, 2:] * 0.5)
    ca_rows = ms_deform_sample(value_r, loc, aw, spatial_shapes, level_start_index,
                               bs=bs, hw=hw, nh=n_heads, dh=dh)

    # --- cross out-proj + norm1 + FFN + norm3 (fused, K4) ---
    ffn = params['ffn']
    tgt_r = pallas_cross_out_ffn(
        tgt_r, ca_rows, ca['w_out'], ca['b_out'],
        params['norm1']['g'], params['norm1']['b'],
        ffn['w1'], ffn['b1'], ffn['w2'], ffn['b2'],
        params['norm3']['g'], params['norm3']['b'])

    return jnp.transpose(tgt_r.reshape(bs, nq, d), (1, 0, 2))         # (nq, bs, d)


# ------------------------------ parameter init --------------------------------

def init_params(key, d_model, d_ffn, n_heads, n_levels, n_points):
    keys = iter(jax.random.split(key, 16))

    def xavier(din, dout, scale=1.0):
        limit = math.sqrt(6.0 / (din + dout)) * scale
        return jax.random.uniform(next(keys), (din, dout), jnp.float32, -limit, limit)

    def zeros(dout):
        return jnp.zeros((1, dout), jnp.float32)

    def lnp(dm):
        return {'g': jnp.ones((1, dm), jnp.float32), 'b': jnp.zeros((1, dm), jnp.float32)}

    naw = n_heads * n_levels * n_points
    return {
        'self_attn': {'w_qk': xavier(d_model, 2 * d_model), 'b_qk': zeros(2 * d_model),
                      'w_v': xavier(d_model, d_model), 'b_v': zeros(d_model),
                      'w_o': xavier(d_model, d_model), 'b_o': zeros(d_model)},
        'cross_attn': {'w_value': xavier(d_model, d_model), 'b_value': zeros(d_model),
                       'w_samp': xavier(d_model, 3 * naw, scale=0.1),
                       'b_samp': jax.random.uniform(next(keys), (1, 3 * naw),
                                                    jnp.float32, -0.5, 0.5),
                       'w_out': xavier(d_model, d_model), 'b_out': zeros(d_model)},
        'ffn': {'w1': xavier(d_model, d_ffn), 'b1': zeros(d_ffn),
                'w2': xavier(d_ffn, d_model), 'b2': zeros(d_model)},
        'norm1': lnp(d_model), 'norm2': lnp(d_model), 'norm3': lnp(d_model),
    }


# ----------------------------------- main -------------------------------------

if __name__ == "__main__":
    d_model, d_ffn = 64, 128
    n_heads, n_levels, n_points = 4, 2, 4
    nq, bs = 8, 2
    spatial_shapes = ((8, 8), (16, 16))
    level_start_index = (0, 64)
    hw = sum(h * w for h, w in spatial_shapes)            # 320

    key = jax.random.PRNGKey(0)
    k = jax.random.split(key, 8)
    tgt = jax.random.normal(k[0], (nq, bs, d_model), jnp.float32)
    query_pos = jax.random.normal(k[1], (nq, bs, d_model), jnp.float32)
    memory = jax.random.normal(k[2], (hw, bs, d_model), jnp.float32)
    reference_points = jax.nn.sigmoid(
        jax.random.normal(k[3], (nq, bs, n_levels, 4), jnp.float32))
    params = init_params(k[4], d_model, d_ffn, n_heads, n_levels, n_points)

    fwd = jax.jit(functools.partial(
        deformable_decoder_layer_forward,
        n_heads=n_heads, n_levels=n_levels, n_points=n_points,
        spatial_shapes=spatial_shapes, level_start_index=level_start_index))

    out = fwd(params, tgt, query_pos, reference_points, memory)
    jax.block_until_ready(out)

    assert out.shape == (nq, bs, d_model)
    assert bool(jnp.all(jnp.isfinite(out)))
    print("KERNEL_OK")
</pallas_src>

<mosaic_0001>
module attributes {stable_mosaic.version = 11 : i64} {
  func.func @_self_attn_kernel(%arg0: i32, %arg1: memref<1x8x64xf32, #tpu.memory_space<vmem>>, %arg2: memref<1x8x64xf32, #tpu.memory_space<vmem>>, %arg3: memref<64x128xbf16, #tpu.memory_space<vmem>>, %arg4: memref<1x128xf32, #tpu.memory_space<vmem>>, %arg5: memref<64x64xbf16, #tpu.memory_space<vmem>>, %arg6: memref<1x64xf32, #tpu.memory_space<vmem>>, %arg7: memref<64x64xbf16, #tpu.memory_space<vmem>>, %arg8: memref<1x64xf32, #tpu.memory_space<vmem>>, %arg9: memref<1x64xf32, #tpu.memory_space<vmem>>, %arg10: memref<1x64xf32, #tpu.memory_space<vmem>>, %arg11: memref<1x8x64xf32, #tpu.memory_space<vmem>>) attributes {dimension_semantics = [#tpu.dimension_semantics<parallel>], iteration_bounds = array<i64: 2>, scalar_prefetch = 0 : i64, scratch_operands = 0 : i64, tpu.core_type = #tpu.core_type<tc>, window_params = [{transform_indices = @transform_0, window_bounds = array<i64: 1, 8, 64>}, {transform_indices = @transform_1, window_bounds = array<i64: 1, 8, 64>}, {pipeline_mode = #tpu.pipeline_mode<synchronous>, transform_indices = @transform_2, window_bounds = array<i64: 64, 128>}, {pipeline_mode = #tpu.pipeline_mode<synchronous>, transform_indices = @transform_3, window_bounds = array<i64: 1, 128>}, {pipeline_mode = #tpu.pipeline_mode<synchronous>, transform_indices = @transform_4, window_bounds = array<i64: 64, 64>}, {pipeline_mode = #tpu.pipeline_mode<synchronous>, transform_indices = @transform_5, window_bounds = array<i64: 1, 64>}, {pipeline_mode = #tpu.pipeline_mode<synchronous>, transform_indices = @transform_6, window_bounds = array<i64: 64, 64>}, {pipeline_mode = #tpu.pipeline_mode<synchronous>, transform_indices = @transform_7, window_bounds = array<i64: 1, 64>}, {pipeline_mode = #tpu.pipeline_mode<synchronous>, transform_indices = @transform_8, window_bounds = array<i64: 1, 64>}, {pipeline_mode = #tpu.pipeline_mode<synchronous>, transform_indices = @transform_9, window_bounds = array<i64: 1, 64>}, {transform_indices = @transform_10, window_bounds = array<i64: 1, 8, 64>}]} {
    %c0 = arith.constant 0 : index
    %c0_0 = arith.constant 0 : index
    %c0_1 = arith.constant 0 : index
    %0 = vector.load %arg1[%c0, %c0_0, %c0_1] : memref<1x8x64xf32, #tpu.memory_space<vmem>>, vector<1x8x64xf32>
    %1 = vector.shape_cast %0 : vector<1x8x64xf32> to vector<8x64xf32>
    %c0_2 = arith.constant 0 : index
    %c0_3 = arith.constant 0 : index
    %c0_4 = arith.constant 0 : index
    %2 = vector.load %arg2[%c0_2, %c0_3, %c0_4] : memref<1x8x64xf32, #tpu.memory_space<vmem>>, vector<1x8x64xf32>
    %3 = vector.shape_cast %2 : vector<1x8x64xf32> to vector<8x64xf32>
    %4 = arith.addf %1, %3 : vector<8x64xf32>
    %5 = arith.truncf %4 : vector<8x64xf32> to vector<8x64xbf16>
    %c0_5 = arith.constant 0 : index
    %c0_6 = arith.constant 0 : index
    %6 = vector.load %arg3[%c0_5, %c0_6] : memref<64x128xbf16, #tpu.memory_space<vmem>>, vector<64x128xbf16>
    %cst = arith.constant dense<0.000000e+00> : vector<8x128xf32>
    %7 = tpu.matmul %5, %6, %cst {dimension_numbers = #tpu.dot_dimension_numbers<[1], [0], [0], [1], [0, 0, 1, 1], [], []>} : vector<8x64xbf16>, vector<64x128xbf16>, vector<8x128xf32> -> vector<8x128xf32>
    %c0_7 = arith.constant 0 : index
    %c0_8 = arith.constant 0 : index
    %8 = vector.load %arg4[%c0_7, %c0_8] : memref<1x128xf32, #tpu.memory_space<vmem>>, vector<1x128xf32>
    %9 = vector.broadcast %8 : vector<1x128xf32> to vector<8x128xf32>
    %10 = arith.addf %7, %9 : vector<8x128xf32>
    %11 = arith.truncf %1 : vector<8x64xf32> to vector<8x64xbf16>
    %c0_9 = arith.constant 0 : index
    %c0_10 = arith.constant 0 : index
    %12 = vector.load %arg5[%c0_9, %c0_10] : memref<64x64xbf16, #tpu.memory_space<vmem>>, vector<64x64xbf16>
    %cst_11 = arith.constant dense<0.000000e+00> : vector<8x64xf32>
    %13 = tpu.matmul %11, %12, %cst_11 {dimension_numbers = #tpu.dot_dimension_numbers<[1], [0], [0], [1], [0, 0, 1, 1], [], []>} : vector<8x64xbf16>, vector<64x64xbf16>, vector<8x64xf32> -> vector<8x64xf32>
    %c0_12 = arith.constant 0 : index
    %c0_13 = arith.constant 0 : index
    %14 = vector.load %arg6[%c0_12, %c0_13] : memref<1x64xf32, #tpu.memory_space<vmem>>, vector<1x64xf32>
    %15 = vector.broadcast %14 : vector<1x64xf32> to vector<8x64xf32>
    %16 = arith.addf %13, %15 : vector<8x64xf32>
    %17 = vector.extract_strided_slice %10 {offsets = [0, 0], sizes = [8, 16], strides = [1, 1]} : vector<8x128xf32> to vector<8x16xf32>
    %18 = vector.extract_strided_slice %10 {offsets = [0, 64], sizes = [8, 16], strides = [1, 1]} : vector<8x128xf32> to vector<8x16xf32>
    %19 = vector.extract_strided_slice %16 {offsets = [0, 0], sizes = [8, 16], strides = [1, 1]} : vector<8x64xf32> to vector<8x16xf32>
    %20 = arith.truncf %17 : vector<8x16xf32> to vector<8x16xbf16>
    %21 = arith.truncf %18 : vector<8x16xf32> to vector<8x16xbf16>
    %cst_14 = arith.constant dense<0.000000e+00> : vector<8x8xf32>
    %22 = tpu.matmul %20, %21, %cst_14 {dimension_numbers = #tpu.dot_dimension_numbers<[1], [1], [0], [0], [0, 0, 1, 0], [], []>} : vector<8x16xbf16>, vector<8x16xbf16>, vector<8x8xf32> -> vector<8x8xf32>
    %cst_15 = arith.constant dense<0xFF800000> : vector<8xf32>
    %23 = vector.multi_reduction <maximumf>, %22, %cst_15 [1] : vector<8x8xf32> to vector<8xf32>
    %24 = vector.shape_cast %23 : vector<8xf32> to vector<8x1xf32>
    %25 = vector.broadcast %24 : vector<8x1xf32> to vector<8x8xf32>
    %26 = arith.subf %22, %25 : vector<8x8xf32>
    %27 = math.exp %26 : vector<8x8xf32>
    %cst_16 = arith.constant dense<0.000000e+00> : vector<8xf32>
    %28 = vector.multi_reduction <add>, %27, %cst_16 [1] : vector<8x8xf32> to vector<8xf32>
    %29 = vector.shape_cast %28 : vector<8xf32> to vector<8x1xf32>
    %30 = tpu.reciprocal %29 {approx = true} : vector<8x1xf32> -> vector<8x1xf32>
    %31 = vector.broadcast %30 : vector<8x1xf32> to vector<8x8xf32>
    %32 = arith.mulf %27, %31 : vector<8x8xf32>
    %33 = arith.truncf %32 : vector<8x8xf32> to vector<8x8xbf16>
    %34 = arith.truncf %19 : vector<8x16xf32> to vector<8x16xbf16>
    %cst_17 = arith.constant dense<0.000000e+00> : vector<8x16xf32>
    %35 = tpu.matmul %33, %34, %cst_17 {dimension_numbers = #tpu.dot_dimension_numbers<[1], [0], [0], [1], [0, 0, 1, 1], [], []>} : vector<8x8xbf16>, vector<8x16xbf16>, vector<8x16xf32> -> vector<8x16xf32>
    %36 = vector.extract_strided_slice %10 {offsets = [0, 16], sizes = [8, 16], strides = [1, 1]} : vector<8x128xf32> to vector<8x16xf32>
    %37 = vector.extract_strided_slice %10 {offsets = [0, 80], sizes = [8, 16], strides = [1, 1]} : vector<8x128xf32> to vector<8x16xf32>
    %38 = vector.extract_strided_slice %16 {offsets = [0, 16], sizes = [8, 16], strides = [1, 1]} : vector<8x64xf32> to vector<8x16xf32>
    %39 = arith.truncf %36 : vector<8x16xf32> to vector<8x16xbf16>
    %40 = arith.truncf %37 : vector<8x16xf32> to vector<8x16xbf16>
    %cst_18 = arith.constant dense<0.000000e+00> : vector<8x8xf32>
    %41 = tpu.matmul %39, %40, %cst_18 {dimension_numbers = #tpu.dot_dimension_numbers<[1], [1], [0], [0], [0, 0, 1, 0], [], []>} : vector<8x16xbf16>, vector<8x16xbf16>, vector<8x8xf32> -> vector<8x8xf32>
    %cst_19 = arith.constant dense<0xFF800000> : vector<8xf32>
    %42 = vector.multi_reduction <maximumf>, %41, %cst_19 [1] : vector<8x8xf32> to vector<8xf32>
    %43 = vector.shape_cast %42 : vector<8xf32> to vector<8x1xf32>
    %44 = vector.broadcast %43 : vector<8x1xf32> to vector<8x8xf32>
    %45 = arith.subf %41, %44 : vector<8x8xf32>
    %46 = math.exp %45 : vector<8x8xf32>
    %cst_20 = arith.constant dense<0.000000e+00> : vector<8xf32>
    %47 = vector.multi_reduction <add>, %46, %cst_20 [1] : vector<8x8xf32> to vector<8xf32>
    %48 = vector.shape_cast %47 : vector<8xf32> to vector<8x1xf32>
    %49 = tpu.reciprocal %48 {approx = true} : vector<8x1xf32> -> vector<8x1xf32>
    %50 = vector.broadcast %49 : vector<8x1xf32> to vector<8x8xf32>
    %51 = arith.mulf %46, %50 : vector<8x8xf32>
    %52 = arith.truncf %51 : vector<8x8xf32> to vector<8x8xbf16>
    %53 = arith.truncf %38 : vector<8x16xf32> to vector<8x16xbf16>
    %cst_21 = arith.constant dense<0.000000e+00> : vector<8x16xf32>
    %54 = tpu.matmul %52, %53, %cst_21 {dimension_numbers = #tpu.dot_dimension_numbers<[1], [0], [0], [1], [0, 0, 1, 1], [], []>} : vector<8x8xbf16>, vector<8x16xbf16>, vector<8x16xf32> -> vector<8x16xf32>
    %55 = vector.extract_strided_slice %10 {offsets = [0, 32], sizes = [8, 16], strides = [1, 1]} : vector<8x128xf32> to vector<8x16xf32>
    %56 = vector.extract_strided_slice %10 {offsets = [0, 96], sizes = [8, 16], strides = [1, 1]} : vector<8x128xf32> to vector<8x16xf32>
    %57 = vector.extract_strided_slice %16 {offsets = [0, 32], sizes = [8, 16], strides = [1, 1]} : vector<8x64xf32> to vector<8x16xf32>
    %58 = arith.truncf %55 : vector<8x16xf32> to vector<8x16xbf16>
    %59 = arith.truncf %56 : vector<8x16xf32> to vector<8x16xbf16>
    %cst_22 = arith.constant dense<0.000000e+00> : vector<8x8xf32>
    %60 = tpu.matmul %58, %59, %cst_22 {dimension_numbers = #tpu.dot_dimension_numbers<[1], [1], [0], [0], [0, 0, 1, 0], [], []>} : vector<8x16xbf16>, vector<8x16xbf16>, vector<8x8xf32> -> vector<8x8xf32>
    %cst_23 = arith.constant dense<0xFF800000> : vector<8xf32>
    %61 = vector.multi_reduction <maximumf>, %60, %cst_23 [1] : vector<8x8xf32> to vector<8xf32>
    %62 = vector.shape_cast %61 : vector<8xf32> to vector<8x1xf32>
    %63 = vector.broadcast %62 : vector<8x1xf32> to vector<8x8xf32>
    %64 = arith.subf %60, %63 : vector<8x8xf32>
    %65 = math.exp %64 : vector<8x8xf32>
    %cst_24 = arith.constant dense<0.000000e+00> : vector<8xf32>
    %66 = vector.multi_reduction <add>, %65, %cst_24 [1] : vector<8x8xf32> to vector<8xf32>
    %67 = vector.shape_cast %66 : vector<8xf32> to vector<8x1xf32>
    %68 = tpu.reciprocal %67 {approx = true} : vector<8x1xf32> -> vector<8x1xf32>
    %69 = vector.broadcast %68 : vector<8x1xf32> to vector<8x8xf32>
    %70 = arith.mulf %65, %69 : vector<8x8xf32>
    %71 = arith.truncf %70 : vector<8x8xf32> to vector<8x8xbf16>
    %72 = arith.truncf %57 : vector<8x16xf32> to vector<8x16xbf16>
    %cst_25 = arith.constant dense<0.000000e+00> : vector<8x16xf32>
    %73 = tpu.matmul %71, %72, %cst_25 {dimension_numbers = #tpu.dot_dimension_numbers<[1], [0], [0], [1], [0, 0, 1, 1], [], []>} : vector<8x8xbf16>, vector<8x16xbf16>, vector<8x16xf32> -> vector<8x16xf32>
    %74 = vector.extract_strided_slice %10 {offsets = [0, 48], sizes = [8, 16], strides = [1, 1]} : vector<8x128xf32> to vector<8x16xf32>
    %75 = vector.extract_strided_slice %10 {offsets = [0, 112], sizes = [8, 16], strides = [1, 1]} : vector<8x128xf32> to vector<8x16xf32>
    %76 = vector.extract_strided_slice %16 {offsets = [0, 48], sizes = [8, 16], strides = [1, 1]} : vector<8x64xf32> to vector<8x16xf32>
    %77 = arith.truncf %74 : vector<8x16xf32> to vector<8x16xbf16>
    %78 = arith.truncf %75 : vector<8x16xf32> to vector<8x16xbf16>
    %cst_26 = arith.constant dense<0.000000e+00> : vector<8x8xf32>
    %79 = tpu.matmul %77, %78, %cst_26 {dimension_numbers = #tpu.dot_dimension_numbers<[1], [1], [0], [0], [0, 0, 1, 0], [], []>} : vector<8x16xbf16>, vector<8x16xbf16>, vector<8x8xf32> -> vector<8x8xf32>
    %cst_27 = arith.constant dense<0xFF800000> : vector<8xf32>
    %80 = vector.multi_reduction <maximumf>, %79, %cst_27 [1] : vector<8x8xf32> to vector<8xf32>
    %81 = vector.shape_cast %80 : vector<8xf32> to vector<8x1xf32>
    %82 = vector.broadcast %81 : vector<8x1xf32> to vector<8x8xf32>
    %83 = arith.subf %79, %82 : vector<8x8xf32>
    %84 = math.exp %83 : vector<8x8xf32>
    %cst_28 = arith.constant dense<0.000000e+00> : vector<8xf32>
    %85 = vector.multi_reduction <add>, %84, %cst_28 [1] : vector<8x8xf32> to vector<8xf32>
    %86 = vector.shape_cast %85 : vector<8xf32> to vector<8x1xf32>
    %87 = tpu.reciprocal %86 {approx = true} : vector<8x1xf32> -> vector<8x1xf32>
    %88 = vector.broadcast %87 : vector<8x1xf32> to vector<8x8xf32>
    %89 = arith.mulf %84, %88 : vector<8x8xf32>
    %90 = arith.truncf %89 : vector<8x8xf32> to vector<8x8xbf16>
    %91 = arith.truncf %76 : vector<8x16xf32> to vector<8x16xbf16>
    %cst_29 = arith.constant dense<0.000000e+00> : vector<8x16xf32>
    %92 = tpu.matmul %90, %91, %cst_29 {dimension_numbers = #tpu.dot_dimension_numbers<[1], [0], [0], [1], [0, 0, 1, 1], [], []>} : vector<8x8xbf16>, vector<8x16xbf16>, vector<8x16xf32> -> vector<8x16xf32>
    %93 = tpu.concatenate %35, %54, %73, %92 in 1 : vector<8x16xf32>, vector<8x16xf32>, vector<8x16xf32>, vector<8x16xf32> -> vector<8x64xf32>
    %94 = arith.truncf %93 : vector<8x64xf32> to vector<8x64xbf16>
    %c0_30 = arith.constant 0 : index
    %c0_31 = arith.constant 0 : index
    %95 = vector.load %arg7[%c0_30, %c0_31] : memref<64x64xbf16, #tpu.memory_space<vmem>>, vector<64x64xbf16>
    %cst_32 = arith.constant dense<0.000000e+00> : vector<8x64xf32>
    %96 = tpu.matmul %94, %95, %cst_32 {dimension_numbers = #tpu.dot_dimension_numbers<[1], [0], [0], [1], [0, 0, 1, 1], [], []>} : vector<8x64xbf16>, vector<64x64xbf16>, vector<8x64xf32> -> vector<8x64xf32>
    %c0_33 = arith.constant 0 : index
    %c0_34 = arith.constant 0 : index
    %97 = vector.load %arg8[%c0_33, %c0_34] : memref<1x64xf32, #tpu.memory_space<vmem>>, vector<1x64xf32>
    %98 = vector.broadcast %97 : vector<1x64xf32> to vector<8x64xf32>
    %99 = arith.addf %96, %98 : vector<8x64xf32>
    %100 = arith.addf %1, %99 : vector<8x64xf32>
    %c0_35 = arith.constant 0 : index
    %c0_36 = arith.constant 0 : index
    %101 = vector.load %arg9[%c0_35, %c0_36] : memref<1x64xf32, #tpu.memory_space<vmem>>, vector<1x64xf32>
    %c0_37 = arith.constant 0 : index
    %c0_38 = arith.constant 0 : index
    %102 = vector.load %arg10[%c0_37, %c0_38] : memref<1x64xf32, #tpu.memory_space<vmem>>, vector<1x64xf32>
    %cst_39 = arith.constant dense<0.000000e+00> : vector<8xf32>
    %103 = vector.multi_reduction <add>, %100, %cst_39 [1] : vector<8x64xf32> to vector<8xf32>
    %104 = vector.shape_cast %103 : vector<8xf32> to vector<8x1xf32>
    %cst_40 = arith.constant 6.400000e+01 : f32
    %105 = vector.broadcast %cst_40 : f32 to vector<8x1xf32>
    %106 = arith.divf %104, %105 : vector<8x1xf32>
    %107 = vector.broadcast %106 : vector<8x1xf32> to vector<8x64xf32>
    %108 = arith.subf %100, %107 : vector<8x64xf32>
    %109 = arith.mulf %108, %108 : vector<8x64xf32>
    %cst_41 = arith.constant dense<0.000000e+00> : vector<8xf32>
    %110 = vector.multi_reduction <add>, %109, %cst_41 [1] : vector<8x64xf32> to vector<8xf32>
    %111 = vector.shape_cast %110 : vector<8xf32> to vector<8x1xf32>
    %cst_42 = arith.constant 6.400000e+01 : f32
    %112 = vector.broadcast %cst_42 : f32 to vector<8x1xf32>
    %113 = arith.divf %111, %112 : vector<8x1xf32>
    %114 = vector.broadcast %106 : vector<8x1xf32> to vector<8x64xf32>
    %115 = arith.subf %100, %114 : vector<8x64xf32>
    %cst_43 = arith.constant 9.99999974E-6 : f32
    %116 = vector.broadcast %cst_43 : f32 to vector<8x1xf32>
    %117 = arith.addf %113, %116 : vector<8x1xf32>
    %118 = math.rsqrt %117 : vector<8x1xf32>
    %119 = vector.broadcast %118 : vector<8x1xf32> to vector<8x64xf32>
    %120 = arith.mulf %115, %119 : vector<8x64xf32>
    %121 = vector.broadcast %101 : vector<1x64xf32> to vector<8x64xf32>
    %122 = arith.mulf %120, %121 : vector<8x64xf32>
    %123 = vector.broadcast %102 : vector<1x64xf32> to vector<8x64xf32>
    %124 = arith.addf %122, %123 : vector<8x64xf32>
    %125 = vector.shape_cast %124 : vector<8x64xf32> to vector<1x8x64xf32>
    %c0_44 = arith.constant 0 : index
    %c0_45 = arith.constant 0 : index
    %c0_46 = arith.constant 0 : index
    %126 = vector.load %arg11[%c0_44, %c0_45, %c0_46] : memref<1x8x64xf32, #tpu.memory_space<vmem>>, vector<1x8x64xf32>
    tpu.vector_store %arg11[%c0_44, %c0_45, %c0_46], %125 {strides = array<i32>} : memref<1x8x64xf32, #tpu.memory_space<vmem>>, vector<1x8x64xf32>,
    return
  }
  func.func @transform_0(%arg0: i32) -> (i32, i32, i32) {
    %c0_i32 = arith.constant 0 : i32
    %c0_i32_0 = arith.constant 0 : i32
    %c0_i32_1 = arith.constant 0 : i32
    return %arg0, %c0_i32, %c0_i32_0 : i32, i32, i32
  }
  func.func @transform_1(%arg0: i32) -> (i32, i32, i32) {
    %c0_i32 = arith.constant 0 : i32
    %c0_i32_0 = arith.constant 0 : i32
    %c0_i32_1 = arith.constant 0 : i32
    return %arg0, %c0_i32, %c0_i32_0 : i32, i32, i32
  }
  func.func @transform_2(%arg0: i32) -> (i32, i32) {
    %c0_i32 = arith.constant 0 : i32
    %c0_i32_0 = arith.constant 0 : i32
    %c0_i32_1 = arith.constant 0 : i32
    return %c0_i32, %c0_i32_0 : i32, i32
  }
  func.func @transform_3(%arg0: i32) -> (i32, i32) {
    %c0_i32 = arith.constant 0 : i32
    %c0_i32_0 = arith.constant 0 : i32
    %c0_i32_1 = arith.constant 0 : i32
    return %c0_i32, %c0_i32_0 : i32, i32
  }
  func.func @transform_4(%arg0: i32) -> (i32, i32) {
    %c0_i32 = arith.constant 0 : i32
    %c0_i32_0 = arith.constant 0 : i32
    %c0_i32_1 = arith.constant 0 : i32
    return %c0_i32, %c0_i32_0 : i32, i32
  }
  func.func @transform_5(%arg0: i32) -> (i32, i32) {
    %c0_i32 = arith.constant 0 : i32
    %c0_i32_0 = arith.constant 0 : i32
    %c0_i32_1 = arith.constant 0 : i32
    return %c0_i32, %c0_i32_0 : i32, i32
  }
  func.func @transform_6(%arg0: i32) -> (i32, i32) {
    %c0_i32 = arith.constant 0 : i32
    %c0_i32_0 = arith.constant 0 : i32
    %c0_i32_1 = arith.constant 0 : i32
    return %c0_i32, %c0_i32_0 : i32, i32
  }
  func.func @transform_7(%arg0: i32) -> (i32, i32) {
    %c0_i32 = arith.constant 0 : i32
    %c0_i32_0 = arith.constant 0 : i32
    %c0_i32_1 = arith.constant 0 : i32
    return %c0_i32, %c0_i32_0 : i32, i32
  }
  func.func @transform_8(%arg0: i32) -> (i32, i32) {
    %c0_i32 = arith.constant 0 : i32
    %c0_i32_0 = arith.constant 0 : i32
    %c0_i32_1 = arith.constant 0 : i32
    return %c0_i32, %c0_i32_0 : i32, i32
  }
  func.func @transform_9(%arg0: i32) -> (i32, i32) {
    %c0_i32 = arith.constant 0 : i32
    %c0_i32_0 = arith.constant 0 : i32
    %c0_i32_1 = arith.constant 0 : i32
    return %c0_i32, %c0_i32_0 : i32, i32
  }
  func.func @transform_10(%arg0: i32) -> (i32, i32, i32) {
    %c0_i32 = arith.constant 0 : i32
    %c0_i32_0 = arith.constant 0 : i32
    %c0_i32_1 = arith.constant 0 : i32
    return %arg0, %c0_i32, %c0_i32_0 : i32, i32, i32
  }
}

module attributes {stable_mosaic.version = 11 : i64} {
  func.func @_linear_kernel(%arg0: i32, %arg1: memref<640x64xf32, #tpu.memory_space<vmem>>, %arg2: memref<64x64xbf16, #tpu.memory_space<vmem>>, %arg3: memref<1x64xf32, #tpu.memory_space<vmem>>, %arg4: memref<640x64xbf16, #tpu.memory_space<vmem>>) attributes {dimension_semantics = [#tpu.dimension_semantics<parallel>], iteration_bounds = array<i64: 1>, scalar_prefetch = 0 : i64, scratch_operands = 0 : i64, tpu.core_type = #tpu.core_type<tc>, window_params = [{transform_indices = @transform_0, window_bounds = array<i64: 640, 64>}, {pipeline_mode = #tpu.pipeline_mode<synchronous>, transform_indices = @transform_1, window_bounds = array<i64: 64, 64>}, {pipeline_mode = #tpu.pipeline_mode<synchronous>, transform_indices = @transform_2, window_bounds = array<i64: 1, 64>}, {transform_indices = @transform_3, window_bounds = array<i64: 640, 64>}]} {
    %c0 = arith.constant 0 : index
    %c0_0 = arith.constant 0 : index
    %0 = vector.load %arg1[%c0, %c0_0] : memref<640x64xf32, #tpu.memory_space<vmem>>, vector<640x64xf32>
    %1 = arith.truncf %0 : vector<640x64xf32> to vector<640x64xbf16>
    %c0_1 = arith.constant 0 : index
    %c0_2 = arith.constant 0 : index
    %2 = vector.load %arg2[%c0_1, %c0_2] : memref<64x64xbf16, #tpu.memory_space<vmem>>, vector<64x64xbf16>
    %cst = arith.constant dense<0.000000e+00> : vector<640x64xf32>
    %3 = tpu.matmul %1, %2, %cst {dimension_numbers = #tpu.dot_dimension_numbers<[1], [0], [0], [1], [0, 0, 1, 1], [], []>} : vector<640x64xbf16>, vector<64x64xbf16>, vector<640x64xf32> -> vector<640x64xf32>
    %c0_3 = arith.constant 0 : index
    %c0_4 = arith.constant 0 : index
    %4 = vector.load %arg3[%c0_3, %c0_4] : memref<1x64xf32, #tpu.memory_space<vmem>>, vector<1x64xf32>
    %5 = vector.broadcast %4 : vector<1x64xf32> to vector<640x64xf32>
    %6 = arith.addf %3, %5 : vector<640x64xf32>
    %7 = arith.truncf %6 : vector<640x64xf32> to vector<640x64xbf16>
    %c0_5 = arith.constant 0 : index
    %c0_6 = arith.constant 0 : index
    %8 = vector.load %arg4[%c0_5, %c0_6] : memref<640x64xbf16, #tpu.memory_space<vmem>>, vector<640x64xbf16>
    tpu.vector_store %arg4[%c0_5, %c0_6], %7 {strides = array<i32>} : memref<640x64xbf16, #tpu.memory_space<vmem>>, vector<640x64xbf16>,
    return
  }
  func.func @transform_0(%arg0: i32) -> (i32, i32) {
    %c0_i32 = arith.constant 0 : i32
    %c0_i32_0 = arith.constant 0 : i32
    return %arg0, %c0_i32 : i32, i32
  }
  func.func @transform_1(%arg0: i32) -> (i32, i32) {
    %c0_i32 = arith.constant 0 : i32
    %c0_i32_0 = arith.constant 0 : i32
    %c0_i32_1 = arith.constant 0 : i32
    return %c0_i32, %c0_i32_0 : i32, i32
  }
  func.func @transform_2(%arg0: i32) -> (i32, i32) {
    %c0_i32 = arith.constant 0 : i32
    %c0_i32_0 = arith.constant 0 : i32
    %c0_i32_1 = arith.constant 0 : i32
    return %c0_i32, %c0_i32_0 : i32, i32
  }
  func.func @transform_3(%arg0: i32) -> (i32, i32) {
    %c0_i32 = arith.constant 0 : i32
    %c0_i32_0 = arith.constant 0 : i32
    return %arg0, %c0_i32 : i32, i32
  }
}

module attributes {stable_mosaic.version = 11 : i64} {
  func.func @_sampling_params_kernel(%arg0: i32, %arg1: memref<16x64xf32, #tpu.memory_space<vmem>>, %arg2: memref<16x64xf32, #tpu.memory_space<vmem>>, %arg3: memref<64x96xbf16, #tpu.memory_space<vmem>>, %arg4: memref<1x96xf32, #tpu.memory_space<vmem>>, %arg5: memref<32x32xf32, #tpu.memory_space<vmem>>, %arg6: memref<16x96xf32, #tpu.memory_space<vmem>>) attributes {dimension_semantics = [#tpu.dimension_semantics<parallel>], iteration_bounds = array<i64: 1>, scalar_prefetch = 0 : i64, scratch_operands = 0 : i64, tpu.core_type = #tpu.core_type<tc>, window_params = [{transform_indices = @transform_0, window_bounds = array<i64: 16, 64>}, {transform_indices = @transform_1, window_bounds = array<i64: 16, 64>}, {pipeline_mode = #tpu.pipeline_mode<synchronous>, transform_indices = @transform_2, window_bounds = array<i64: 64, 96>}, {pipeline_mode = #tpu.pipeline_mode<synchronous>, transform_indices = @transform_3, window_bounds = array<i64: 1, 96>}, {pipeline_mode = #tpu.pipeline_mode<synchronous>, transform_indices = @transform_4, window_bounds = array<i64: 32, 32>}, {transform_indices = @transform_5, window_bounds = array<i64: 16, 96>}]} {
    %c0 = arith.constant 0 : index
    %c0_0 = arith.constant 0 : index
    %0 = vector.load %arg1[%c0, %c0_0] : memref<16x64xf32, #tpu.memory_space<vmem>>, vector<16x64xf32>
    %c0_1 = arith.constant 0 : index
    %c0_2 = arith.constant 0 : index
    %1 = vector.load %arg2[%c0_1, %c0_2] : memref<16x64xf32, #tpu.memory_space<vmem>>, vector<16x64xf32>
    %2 = arith.addf %0, %1 : vector<16x64xf32>
    %3 = arith.truncf %2 : vector<16x64xf32> to vector<16x64xbf16>
    %c0_3 = arith.constant 0 : index
    %c0_4 = arith.constant 0 : index
    %4 = vector.load %arg3[%c0_3, %c0_4] : memref<64x96xbf16, #tpu.memory_space<vmem>>, vector<64x96xbf16>
    %cst = arith.constant dense<0.000000e+00> : vector<16x96xf32>
    %5 = tpu.matmul %3, %4, %cst {dimension_numbers = #tpu.dot_dimension_numbers<[1], [0], [0], [1], [0, 0, 1, 1], [], []>} : vector<16x64xbf16>, vector<64x96xbf16>, vector<16x96xf32> -> vector<16x96xf32>
    %c0_5 = arith.constant 0 : index
    %c0_6 = arith.constant 0 : index
    %6 = vector.load %arg4[%c0_5, %c0_6] : memref<1x96xf32, #tpu.memory_space<vmem>>, vector<1x96xf32>
    %7 = vector.broadcast %6 : vector<1x96xf32> to vector<16x96xf32>
    %8 = arith.addf %5, %7 : vector<16x96xf32>
    %9 = vector.extract_strided_slice %8 {offsets = [0, 0], sizes = [16, 64], strides = [1, 1]} : vector<16x96xf32> to vector<16x64xf32>
    %10 = vector.extract_strided_slice %8 {offsets = [0, 64], sizes = [16, 32], strides = [1, 1]} : vector<16x96xf32> to vector<16x32xf32>
    %cst_7 = arith.constant dense<0xFF800000> : vector<16xf32>
    %11 = vector.multi_reduction <maximumf>, %10, %cst_7 [1] : vector<16x32xf32> to vector<16xf32>
    %12 = vector.shape_cast %11 : vector<16xf32> to vector<16x1xf32>
    %13 = vector.broadcast %12 : vector<16x1xf32> to vector<16x32xf32>
    %14 = arith.subf %10, %13 : vector<16x32xf32>
    %15 = math.exp %14 : vector<16x32xf32>
    %c0_8 = arith.constant 0 : index
    %c0_9 = arith.constant 0 : index
    %16 = vector.load %arg5[%c0_8, %c0_9] : memref<32x32xf32, #tpu.memory_space<vmem>>, vector<32x32xf32>
    %cst_10 = arith.constant dense<0.000000e+00> : vector<16x32xf32>
    %17 = tpu.matmul %15, %16, %cst_10 {dimension_numbers = #tpu.dot_dimension_numbers<[1], [0], [0], [1], [0, 0, 1, 1], [], []>} : vector<16x32xf32>, vector<32x32xf32>, vector<16x32xf32> -> vector<16x32xf32>
    %18 = tpu.reciprocal %17 {approx = true} : vector<16x32xf32> -> vector<16x32xf32>
    %19 = arith.mulf %15, %18 : vector<16x32xf32>
    %20 = tpu.concatenate %9, %19 in 1 : vector<16x64xf32>, vector<16x32xf32> -> vector<16x96xf32>
    %c0_11 = arith.constant 0 : index
    %c0_12 = arith.constant 0 : index
    %21 = vector.load %arg6[%c0_11, %c0_12] : memref<16x96xf32, #tpu.memory_space<vmem>>, vector<16x96xf32>
    tpu.vector_store %arg6[%c0_11, %c0_12], %20 {strides = array<i32>} : memref<16x96xf32, #tpu.memory_space<vmem>>, vector<16x96xf32>,
    return
  }
  func.func @transform_0(%arg0: i32) -> (i32, i32) {
    %c0_i32 = arith.constant 0 : i32
    %c0_i32_0 = arith.constant 0 : i32
    return %arg0, %c0_i32 : i32, i32
  }
  func.func @transform_1(%arg0: i32) -> (i32, i32) {
    %c0_i32 = arith.constant 0 : i32
    %c0_i32_0 = arith.constant 0 : i32
    return %arg0, %c0_i32 : i32, i32
  }
  func.func @transform_2(%arg0: i32) -> (i32, i32) {
    %c0_i32 = arith.constant 0 : i32
    %c0_i32_0 = arith.constant 0 : i32
    %c0_i32_1 = arith.constant 0 : i32
    return %c0_i32, %c0_i32_0 : i32, i32
  }
  func.func @transform_3(%arg0: i32) -> (i32, i32) {
    %c0_i32 = arith.constant 0 : i32
    %c0_i32_0 = arith.constant 0 : i32
    %c0_i32_1 = arith.constant 0 : i32
    return %c0_i32, %c0_i32_0 : i32, i32
  }
  func.func @transform_4(%arg0: i32) -> (i32, i32) {
    %c0_i32 = arith.constant 0 : i32
    %c0_i32_0 = arith.constant 0 : i32
    %c0_i32_1 = arith.constant 0 : i32
    return %c0_i32, %c0_i32_0 : i32, i32
  }
  func.func @transform_5(%arg0: i32) -> (i32, i32) {
    %c0_i32 = arith.constant 0 : i32
    %c0_i32_0 = arith.constant 0 : i32
    return %arg0, %c0_i32 : i32, i32
  }
}

module attributes {stable_mosaic.version = 11 : i64} {
  func.func @_cross_out_ffn_kernel(%arg0: i32, %arg1: memref<16x64xf32, #tpu.memory_space<vmem>>, %arg2: memref<16x64xf32, #tpu.memory_space<vmem>>, %arg3: memref<64x64xbf16, #tpu.memory_space<vmem>>, %arg4: memref<1x64xf32, #tpu.memory_space<vmem>>, %arg5: memref<1x64xf32, #tpu.memory_space<vmem>>, %arg6: memref<1x64xf32, #tpu.memory_space<vmem>>, %arg7: memref<64x128xbf16, #tpu.memory_space<vmem>>, %arg8: memref<1x128xf32, #tpu.memory_space<vmem>>, %arg9: memref<128x64xbf16, #tpu.memory_space<vmem>>, %arg10: memref<1x64xf32, #tpu.memory_space<vmem>>, %arg11: memref<1x64xf32, #tpu.memory_space<vmem>>, %arg12: memref<1x64xf32, #tpu.memory_space<vmem>>, %arg13: memref<16x64xf32, #tpu.memory_space<vmem>>) attributes {dimension_semantics = [#tpu.dimension_semantics<parallel>], iteration_bounds = array<i64: 1>, scalar_prefetch = 0 : i64, scratch_operands = 0 : i64, tpu.core_type = #tpu.core_type<tc>, window_params = [{transform_indices = @transform_0, window_bounds = array<i64: 16, 64>}, {transform_indices = @transform_1, window_bounds = array<i64: 16, 64>}, {pipeline_mode = #tpu.pipeline_mode<synchronous>, transform_indices = @transform_2, window_bounds = array<i64: 64, 64>}, {pipeline_mode = #tpu.pipeline_mode<synchronous>, transform_indices = @transform_3, window_bounds = array<i64: 1, 64>}, {pipeline_mode = #tpu.pipeline_mode<synchronous>, transform_indices = @transform_4, window_bounds = array<i64: 1, 64>}, {pipeline_mode = #tpu.pipeline_mode<synchronous>, transform_indices = @transform_5, window_bounds = array<i64: 1, 64>}, {pipeline_mode = #tpu.pipeline_mode<synchronous>, transform_indices = @transform_6, window_bounds = array<i64: 64, 128>}, {pipeline_mode = #tpu.pipeline_mode<synchronous>, transform_indices = @transform_7, window_bounds = array<i64: 1, 128>}, {pipeline_mode = #tpu.pipeline_mode<synchronous>, transform_indices = @transform_8, window_bounds = array<i64: 128, 64>}, {pipeline_mode = #tpu.pipeline_mode<synchronous>, transform_indices = @transform_9, window_bounds = array<i64: 1, 64>}, {pipeline_mode = #tpu.pipeline_mode<synchronous>, transform_indices = @transform_10, window_bounds = array<i64: 1, 64>}, {pipeline_mode = #tpu.pipeline_mode<synchronous>, transform_indices = @transform_11, window_bounds = array<i64: 1, 64>}, {transform_indices = @transform_12, window_bounds = array<i64: 16, 64>}]} {
    %c0 = arith.constant 0 : index
    %c0_0 = arith.constant 0 : index
    %0 = vector.load %arg1[%c0, %c0_0] : memref<16x64xf32, #tpu.memory_space<vmem>>, vector<16x64xf32>
    %c0_1 = arith.constant 0 : index
    %c0_2 = arith.constant 0 : index
    %1 = vector.load %arg2[%c0_1, %c0_2] : memref<16x64xf32, #tpu.memory_space<vmem>>, vector<16x64xf32>
    %2 = arith.truncf %1 : vector<16x64xf32> to vector<16x64xbf16>
    %c0_3 = arith.constant 0 : index
    %c0_4 = arith.constant 0 : index
    %3 = vector.load %arg3[%c0_3, %c0_4] : memref<64x64xbf16, #tpu.memory_space<vmem>>, vector<64x64xbf16>
    %cst = arith.constant dense<0.000000e+00> : vector<16x64xf32>
    %4 = tpu.matmul %2, %3, %cst {dimension_numbers = #tpu.dot_dimension_numbers<[1], [0], [0], [1], [0, 0, 1, 1], [], []>} : vector<16x64xbf16>, vector<64x64xbf16>, vector<16x64xf32> -> vector<16x64xf32>
    %c0_5 = arith.constant 0 : index
    %c0_6 = arith.constant 0 : index
    %5 = vector.load %arg4[%c0_5, %c0_6] : memref<1x64xf32, #tpu.memory_space<vmem>>, vector<1x64xf32>
    %6 = vector.broadcast %5 : vector<1x64xf32> to vector<16x64xf32>
    %7 = arith.addf %4, %6 : vector<16x64xf32>
    %8 = arith.addf %0, %7 : vector<16x64xf32>
    %c0_7 = arith.constant 0 : index
    %c0_8 = arith.constant 0 : index
    %9 = vector.load %arg5[%c0_7, %c0_8] : memref<1x64xf32, #tpu.memory_space<vmem>>, vector<1x64xf32>
    %c0_9 = arith.constant 0 : index
    %c0_10 = arith.constant 0 : index
    %10 = vector.load %arg6[%c0_9, %c0_10] : memref<1x64xf32, #tpu.memory_space<vmem>>, vector<1x64xf32>
    %cst_11 = arith.constant dense<0.000000e+00> : vector<16xf32>
    %11 = vector.multi_reduction <add>, %8, %cst_11 [1] : vector<16x64xf32> to vector<16xf32>
    %12 = vector.shape_cast %11 : vector<16xf32> to vector<16x1xf32>
    %cst_12 = arith.constant 6.400000e+01 : f32
    %13 = vector.broadcast %cst_12 : f32 to vector<16x1xf32>
    %14 = arith.divf %12, %13 : vector<16x1xf32>
    %15 = vector.broadcast %14 : vector<16x1xf32> to vector<16x64xf32>
    %16 = arith.subf %8, %15 : vector<16x64xf32>
    %17 = arith.mulf %16, %16 : vector<16x64xf32>
    %cst_13 = arith.constant dense<0.000000e+00> : vector<16xf32>
    %18 = vector.multi_reduction <add>, %17, %cst_13 [1] : vector<16x64xf32> to vector<16xf32>
    %19 = vector.shape_cast %18 : vector<16xf32> to vector<16x1xf32>
    %cst_14 = arith.constant 6.400000e+01 : f32
    %20 = vector.broadcast %cst_14 : f32 to vector<16x1xf32>
    %21 = arith.divf %19, %20 : vector<16x1xf32>
    %22 = vector.broadcast %14 : vector<16x1xf32> to vector<16x64xf32>
    %23 = arith.subf %8, %22 : vector<16x64xf32>
    %cst_15 = arith.constant 9.99999974E-6 : f32
    %24 = vector.broadcast %cst_15 : f32 to vector<16x1xf32>
    %25 = arith.addf %21, %24 : vector<16x1xf32>
    %26 = math.rsqrt %25 : vector<16x1xf32>
    %27 = vector.broadcast %26 : vector<16x1xf32> to vector<16x64xf32>
    %28 = arith.mulf %23, %27 : vector<16x64xf32>
    %29 = vector.broadcast %9 : vector<1x64xf32> to vector<16x64xf32>
    %30 = arith.mulf %28, %29 : vector<16x64xf32>
    %31 = vector.broadcast %10 : vector<1x64xf32> to vector<16x64xf32>
    %32 = arith.addf %30, %31 : vector<16x64xf32>
    %33 = arith.truncf %32 : vector<16x64xf32> to vector<16x64xbf16>
    %c0_16 = arith.constant 0 : index
    %c0_17 = arith.constant 0 : index
    %34 = vector.load %arg7[%c0_16, %c0_17] : memref<64x128xbf16, #tpu.memory_space<vmem>>, vector<64x128xbf16>
    %cst_18 = arith.constant dense<0.000000e+00> : vector<16x128xf32>
    %35 = tpu.matmul %33, %34, %cst_18 {dimension_numbers = #tpu.dot_dimension_numbers<[1], [0], [0], [1], [0, 0, 1, 1], [], []>} : vector<16x64xbf16>, vector<64x128xbf16>, vector<16x128xf32> -> vector<16x128xf32>
    %c0_19 = arith.constant 0 : index
    %c0_20 = arith.constant 0 : index
    %36 = vector.load %arg8[%c0_19, %c0_20] : memref<1x128xf32, #tpu.memory_space<vmem>>, vector<1x128xf32>
    %37 = vector.broadcast %36 : vector<1x128xf32> to vector<16x128xf32>
    %38 = arith.addf %35, %37 : vector<16x128xf32>
    %cst_21 = arith.constant 0.000000e+00 : f32
    %39 = vector.broadcast %cst_21 : f32 to vector<16x128xf32>
    %40 = arith.maximumf %38, %39 : vector<16x128xf32>
    %41 = arith.truncf %40 : vector<16x128xf32> to vector<16x128xbf16>
    %c0_22 = arith.constant 0 : index
    %c0_23 = arith.constant 0 : index
    %42 = vector.load %arg9[%c0_22, %c0_23] : memref<128x64xbf16, #tpu.memory_space<vmem>>, vector<128x64xbf16>
    %cst_24 = arith.constant dense<0.000000e+00> : vector<16x64xf32>
    %43 = tpu.matmul %41, %42, %cst_24 {dimension_numbers = #tpu.dot_dimension_numbers<[1], [0], [0], [1], [0, 0, 1, 1], [], []>} : vector<16x128xbf16>, vector<128x64xbf16>, vector<16x64xf32> -> vector<16x64xf32>
    %c0_25 = arith.constant 0 : index
    %c0_26 = arith.constant 0 : index
    %44 = vector.load %arg10[%c0_25, %c0_26] : memref<1x64xf32, #tpu.memory_space<vmem>>, vector<1x64xf32>
    %45 = vector.broadcast %44 : vector<1x64xf32> to vector<16x64xf32>
    %46 = arith.addf %43, %45 : vector<16x64xf32>
    %47 = arith.addf %32, %46 : vector<16x64xf32>
    %c0_27 = arith.constant 0 : index
    %c0_28 = arith.constant 0 : index
    %48 = vector.load %arg11[%c0_27, %c0_28] : memref<1x64xf32, #tpu.memory_space<vmem>>, vector<1x64xf32>
    %c0_29 = arith.constant 0 : index
    %c0_30 = arith.constant 0 : index
    %49 = vector.load %arg12[%c0_29, %c0_30] : memref<1x64xf32, #tpu.memory_space<vmem>>, vector<1x64xf32>
    %cst_31 = arith.constant dense<0.000000e+00> : vector<16xf32>
    %50 = vector.multi_reduction <add>, %47, %cst_31 [1] : vector<16x64xf32> to vector<16xf32>
    %51 = vector.shape_cast %50 : vector<16xf32> to vector<16x1xf32>
    %cst_32 = arith.constant 6.400000e+01 : f32
    %52 = vector.broadcast %cst_32 : f32 to vector<16x1xf32>
    %53 = arith.divf %51, %52 : vector<16x1xf32>
    %54 = vector.broadcast %53 : vector<16x1xf32> to vector<16x64xf32>
    %55 = arith.subf %47, %54 : vector<16x64xf32>
    %56 = arith.mulf %55, %55 : vector<16x64xf32>
    %cst_33 = arith.constant dense<0.000000e+00> : vector<16xf32>
    %57 = vector.multi_reduction <add>, %56, %cst_33 [1] : vector<16x64xf32> to vector<16xf32>
    %58 = vector.shape_cast %57 : vector<16xf32> to vector<16x1xf32>
    %cst_34 = arith.constant 6.400000e+01 : f32
    %59 = vector.broadcast %cst_34 : f32 to vector<16x1xf32>
    %60 = arith.divf %58, %59 : vector<16x1xf32>
    %61 = vector.broadcast %53 : vector<16x1xf32> to vector<16x64xf32>
    %62 = arith.subf %47, %61 : vector<16x64xf32>
    %cst_35 = arith.constant 9.99999974E-6 : f32
    %63 = vector.broadcast %cst_35 : f32 to vector<16x1xf32>
    %64 = arith.addf %60, %63 : vector<16x1xf32>
    %65 = math.rsqrt %64 : vector<16x1xf32>
    %66 = vector.broadcast %65 : vector<16x1xf32> to vector<16x64xf32>
    %67 = arith.mulf %62, %66 : vector<16x64xf32>
    %68 = vector.broadcast %48 : vector<1x64xf32> to vector<16x64xf32>
    %69 = arith.mulf %67, %68 : vector<16x64xf32>
    %70 = vector.broadcast %49 : vector<1x64xf32> to vector<16x64xf32>
    %71 = arith.addf %69, %70 : vector<16x64xf32>
    %c0_36 = arith.constant 0 : index
    %c0_37 = arith.constant 0 : index
    %72 = vector.load %arg13[%c0_36, %c0_37] : memref<16x64xf32, #tpu.memory_space<vmem>>, vector<16x64xf32>
    tpu.vector_store %arg13[%c0_36, %c0_37], %71 {strides = array<i32>} : memref<16x64xf32, #tpu.memory_space<vmem>>, vector<16x64xf32>,
    return
  }
  func.func @transform_0(%arg0: i32) -> (i32, i32) {
    %c0_i32 = arith.constant 0 : i32
    %c0_i32_0 = arith.constant 0 : i32
    return %arg0, %c0_i32 : i32, i32
  }
  func.func @transform_1(%arg0: i32) -> (i32, i32) {
    %c0_i32 = arith.constant 0 : i32
    %c0_i32_0 = arith.constant 0 : i32
    return %arg0, %c0_i32 : i32, i32
  }
  func.func @transform_2(%arg0: i32) -> (i32, i32) {
    %c0_i32 = arith.constant 0 : i32
    %c0_i32_0 = arith.constant 0 : i32
    %c0_i32_1 = arith.constant 0 : i32
    return %c0_i32, %c0_i32_0 : i32, i32
  }
  func.func @transform_3(%arg0: i32) -> (i32, i32) {
    %c0_i32 = arith.constant 0 : i32
    %c0_i32_0 = arith.constant 0 : i32
    %c0_i32_1 = arith.constant 0 : i32
    return %c0_i32, %c0_i32_0 : i32, i32
  }
  func.func @transform_4(%arg0: i32) -> (i32, i32) {
    %c0_i32 = arith.constant 0 : i32
    %c0_i32_0 = arith.constant 0 : i32
    %c0_i32_1 = arith.constant 0 : i32
    return %c0_i32, %c0_i32_0 : i32, i32
  }
  func.func @transform_5(%arg0: i32) -> (i32, i32) {
    %c0_i32 = arith.constant 0 : i32
    %c0_i32_0 = arith.constant 0 : i32
    %c0_i32_1 = arith.constant 0 : i32
    return %c0_i32, %c0_i32_0 : i32, i32
  }
  func.func @transform_6(%arg0: i32) -> (i32, i32) {
    %c0_i32 = arith.constant 0 : i32
    %c0_i32_0 = arith.constant 0 : i32
    %c0_i32_1 = arith.constant 0 : i32
    return %c0_i32, %c0_i32_0 : i32, i32
  }
  func.func @transform_7(%arg0: i32) -> (i32, i32) {
    %c0_i32 = arith.constant 0 : i32
    %c0_i32_0 = arith.constant 0 : i32
    %c0_i32_1 = arith.constant 0 : i32
    return %c0_i32, %c0_i32_0 : i32, i32
  }
  func.func @transform_8(%arg0: i32) -> (i32, i32) {
    %c0_i32 = arith.constant 0 : i32
    %c0_i32_0 = arith.constant 0 : i32
    %c0_i32_1 = arith.constant 0 : i32
    return %c0_i32, %c0_i32_0 : i32, i32
  }
  func.func @transform_9(%arg0: i32) -> (i32, i32) {
    %c0_i32 = arith.constant 0 : i32
    %c0_i32_0 = arith.constant 0 : i32
    %c0_i32_1 = arith.constant 0 : i32
    return %c0_i32, %c0_i32_0 : i32, i32
  }
  func.func @transform_10(%arg0: i32) -> (i32, i32) {
    %c0_i32 = arith.constant 0 : i32
    %c0_i32_0 = arith.constant 0 : i32
    %c0_i32_1 = arith.constant 0 : i32
    return %c0_i32, %c0_i32_0 : i32, i32
  }
  func.func @transform_11(%arg0: i32) -> (i32, i32) {
    %c0_i32 = arith.constant 0 : i32
    %c0_i32_0 = arith.constant 0 : i32
    %c0_i32_1 = arith.constant 0 : i32
    return %c0_i32, %c0_i32_0 : i32, i32
  }
  func.func @transform_12(%arg0: i32) -> (i32, i32) {
    %c0_i32 = arith.constant 0 : i32
    %c0_i32_0 = arith.constant 0 : i32
    return %arg0, %c0_i32 : i32, i32
  }
}

</mosaic_0001>

<bundles_post_ra>
// kernel: mul.76
= control target key start
LH: loop header
LB: loop body
LE: loop exit
PB: predicated region body
PF: predicated region fallthrough
CT: control target
= control target key end

     0   :  { %3 = vsyncpa [#allocation1], 0  ;;  %s104_s0 = inlined_call_operand.hbm [shape: f32[1,128], index: 0, kind: input, shape index: {}]   ;;  %s105_s1 = inlined_call_operand.hbm [shape: f32[1,128], index: 1, kind: input, shape index: {}]   ;;  %s106_s2 = inlined_call_operand.vmem [shape: f32[1,128], index: 2, kind: output, shape index: {}]  }
   0x1   :  { %4 = vsyncpa [#allocation3], 0  ;;  %s78_s9 = smov [#allocation0]   ;;  %s79_s11 = smov [#allocation2]  }
   0x2   :  { %s9_s10 = sshll.u32 %s78_s9, 4  ;;  %s17_s12 = sshll.u32 %s79_s11, 4  ;;  %s10_s10 = int_to_ptr.vmem [resolvable:$true] %s9_s10  ;;  %s18_s12 = int_to_ptr.vmem [resolvable:$true] %s17_s12 }
   0x3   :  { %s42_s13 = scalar_lea.vmem %s10_s10, 16  ;;  %s46_s14 = scalar_lea.vmem %s10_s10, 32 }
   0x4   :  { %p43_p0 = scmp.ne.s32.totalorder %s10_s10, %s42_s13  ;;  %p47_p1 = scmp.lt.s32.totalorder %s10_s10, %s10_s10 }
   0x5   :  { %p48_p2 = scmp.lt.s32.totalorder %s46_s14, %s42_s13 }
   0x7   :  { %p49_p3 = por %p48_p2, %p47_p1 }
   0x9   :  { %p50_p4 = pnand %p49_p3, %p43_p0 }
   0xb   :  { %53 = shalt.err (!%p50_p4)
}
   0xc   :  { %12 = dma.hbm_to_vmem [thread:$0]  %s104_s0, 16, %s10_s10, [#allocation1]  }
   0xd   :  { %s62_s0 = scalar_lea.vmem %s18_s12, 16  ;;  %s66_s17 = scalar_lea.vmem %s18_s12, 32 }
   0xe   :  { %p63_p5 = scmp.ne.s32.totalorder %s18_s12, %s62_s0  ;;  %p67_p6 = scmp.lt.s32.totalorder %s18_s12, %s18_s12 }
   0xf   :  { %p68_p7 = scmp.lt.s32.totalorder %s66_s17, %s62_s0 }
  0x11   :  { %p69_p8 = por %p68_p7, %p67_p6 }
  0x13   :  { %p70_p9 = pnand %p69_p8, %p63_p5 }
  0x15   :  { %73 = shalt.err (!%p70_p9)
}
  0x16   :  { %20 = dma.hbm_to_vmem [thread:$0]  %s105_s1, 16, %s18_s12, [#allocation3]  }
  0x17   :  { %74 = dma.done.wait [#allocation1], 16  }
  0x18   :  { %75 = vsyncadd [#allocation1], 4294967280 }
  0x19   :  { %76 = dma.done.wait [#allocation3], 16  }
  0x1a   :  { %77 = vsyncadd [#allocation3], 4294967280  ;;  %v23_v0 = vld [vmem:[#allocation0] sm:$0x1]  ;;  %v24_v1 = vld [vmem:[#allocation2] sm:$0x1] }
  0x1b   :  { %v27_v2 = vmul.f32 %v24_v1, %v23_v0 }
  0x1d   :  { %29 = vst [vmem:[%s106_s2] sm:$0x1] %v27_v2 }
  0x1e   :  { %30 = vsyncpa [#allocation1], 1 }
  0x1f   :  { %31 = vsyncpa [#allocation3], 1 }

// kernel: eq.8
= control target key start
LH: loop header
LB: loop body
LE: loop exit
PB: predicated region body
PF: predicated region fallthrough
CT: control target
= control target key end

     0   :  { %vm8_vm0 = vcmask 64512   ;;  %s40_s8 = smov 8   ;;  %s41_s9 = smov 16   ;;  %vm14_vm1 = vcmask 261312   ;;  %vm20_vm2 = vcmask 195712   ;;  %vm26_vm3 = vcmask 130112   ;;  %s58_s0 = inlined_call_operand.vmem [shape: s32[4,8], index: 0, kind: input, shape index: {}]   ;;  %s59_s1 = inlined_call_operand.vmem [shape: s32[32], index: 1, kind: output, shape index: {}]  }
   0x1   :  { %v5_v0 = vld [vmem:[%s58_s0] sm:$0xf]  ;;  %s39_s0 = smov 24  }
   0x2   :  { %6 = vst [vmem:[#allocation1] sm:$0xf] %v5_v0 }
   0x9   :  { %v11_v1 = vld [vmem:[#allocation1 + $0x3] sm:$0x1]   ;;  %v23_v2 = vld [vmem:[#allocation1 + $0x1] sm:$0x1]   ;;  %v7_v3 = vld [vmem:[#allocation1] sm:$0x1]  }
   0xa   :  { %12 = vrot.lane.b32.xlu0 %v11_v1, %s39_s0  ;;  %24 = vrot.lane.b32.xlu1 %v23_v2, %s40_s8  ;;  %v17_v4 = vld [vmem:[#allocation1 + $0x2] sm:$0x1]   ;;  %9 = vst.msk [vmem:[#allocation0] sm:$0x1] %vm8_vm0, %v7_v3  }
   0xe   :  { %18 = vrot.lane.b32.xlu0 %v17_v4, %s41_s9 }
  0x7c   :  { %v13_v5 = vpop.permute.xlu0 %12   ;;  %v25_v6 = vpop.permute.xlu1 %24  }
  0x7d   :  { %15 = vst.msk [vmem:[#allocation0] sm:$0x1] %vm14_vm1, %v13_v5  }
  0x80   :  { %v19_v7 = vpop.permute.xlu0 %18  }
  0x81   :  { %21 = vst.msk [vmem:[#allocation0] sm:$0x1] %vm20_vm2, %v19_v7  }
  0x82   :  { %27 = vst.msk [vmem:[#allocation0] sm:$0x1] %vm26_vm3, %v25_v6  }
  0x89   :  { %v32_v8 = vld [vmem:[#allocation0] sm:$0x1] }
  0x8a   :  { %35 = vst [vmem:[%s59_s1] sm:$0x1] %v32_v8 }

// kernel: deformable_decoder_layer_forward.4
= control target key start
LH: loop header
LB: loop body
LE: loop exit
PB: predicated region body
PF: predicated region fallthrough
CT: control target
= control target key end

     0   :  { %15 = vsyncpa [#allocation3], 0  ;;  %s1952_s0 = inlined_call_operand.vmem [shape: f32[2,8,64], index: 0, kind: input, shape index: {}]   ;;  %s1953_s1 = inlined_call_operand.vmem [shape: f32[2,8,64], index: 1, kind: input, shape index: {}]   ;;  %s1954_s2 = inlined_call_operand.vmem [shape: bf16[64,128], index: 2, kind: input, shape index: {}]   ;;  %s1955_s3 = inlined_call_operand.vmem [shape: f32[1,128], index: 3, kind: input, shape index: {}]   ;;  %s1956_s4 = inlined_call_operand.vmem [shape: bf16[64,64], index: 4, kind: input, shape index: {}]   ;;  %s1957_s5 = inlined_call_operand.hbm [shape: f32[1,64], index: 5, kind: input, shape index: {}]   ;;  %s1958_s6 = inlined_call_operand.vmem [shape: bf16[64,64], index: 6, kind: input, shape index: {}]   ;;  %s1959_s7 = inlined_call_operand.hbm [shape: f32[1,64], index: 7, kind: input, shape index: {}]   ;;  %s1960_s8 = inlined_call_operand.hbm [shape: f32[1,64], index: 8, kind: input, shape index: {}]   ;;  %s1961_s9 = inlined_call_operand.hbm [shape: f32[1,64], index: 9, kind: input, shape index: {}]   ;;  %s1962_s10 = inlined_call_operand.vmem [shape: f32[2,8,64], index: 10, kind: output, shape index: {}]  }
   0x1   :  { %16 = vsyncpa [#allocation5], 0 }
   0x2   :  { %17 = vsyncpa [#allocation8], 0  ;;  %s1716_s13 = smov 0  }
   0x3 LB: > { %s1722_s14 = sadd.s32 4294967295, %s1646_s13   ;;  %p1277_p0 = scmp.ge.s32.totalorder %s1646_s13, 1  ;;  %s1646_s13 = sphi %s1716_s13, %s23_s13  }
   0x4   : > { %p274_p1 = scmp.lt.s32.totalorder %s1646_s13, 3  ;;  %p1963_p2 = scmp.eq.s32.totalorder %s1722_s14, 0 }
   0x5   : > { %s1648_s15 = smov [#allocation4]   ;;  %s1649_s18 = smov [#allocation2]  }
   0x6   : > { %s310_s16 = sshll.u32 %s1648_s15, 4  ;;  %p1727_p3 = pnand %p1277_p0, %p274_p1  ;;  %s311_s16 = int_to_ptr.vmem [resolvable:$true] %s310_s16 }
   0x7   : > { %s296_s19 = sshll.u32 %s1649_s18, 4  ;;  %s1650_s20 = smov [#allocation6]   ;;  %s297_s19 = int_to_ptr.vmem [resolvable:$true] %s296_s19 }
   0x8   : > { %p1452_p4 = pneg %p1727_p3  ;;  %s321_s21 = sshll.u32 %s1650_s20, 4  ;;  %s1739_s21 = int_to_ptr.vmem [resolvable:$true] %s321_s21 }
   0x9   : > { %s1651_s23 = smov [#allocation7]   ;;  %s1535_s25 = scalar_lea.vmem %s311_s16, 16 }
   0xa   : > { %p1735_p5 = pnand %p1963_p2, %p1452_p4  ;;  %s332_s24 = sshll.u32 %s1651_s23, 4  ;;  %s1741_s24 = int_to_ptr.vmem [resolvable:$true] %s332_s24 }
   0xb   : > { %p1536_p7 = scmp.ne.s32.totalorder %s311_s16, %s1535_s25  ;;  %s1542_s26 = scalar_lea.vmem %s311_s16, 32 }
   0xc   : > { %p1526_p6 = pneg %p1735_p5  ;;  %p1543_p10 = scmp.lt.s32.totalorder %s311_s16, %s311_s16 }
   0xd   : > { %p1544_p11 = scmp.lt.s32.totalorder %s1542_s26, %s1535_s25 }
   0xe   : > { %p1538_p8 = pnand %p1536_p7, %p1526_p6 }
   0xf   : > { %p1545_p12 = por %p1544_p11, %p1543_p10 }
  0x10   : > { %p1539_p9 = pneg %p1538_p8 }
  0x12   : > { %p1546_p13 = pnand %p1545_p12, %p1539_p9 }
  0x14   : > { %1549 = shalt.err (!%p1546_p13)
}
  0x15   : > { %1458 = dma.hbm_to_vmem [thread:$0]  (!%p1735_p5), %s1959_s7, 16, %s311_s16, [#allocation5]  }
  0x16   : > { %s1561_s29 = scalar_lea.vmem %s297_s19, 16  ;;  %s1568_s30 = scalar_lea.vmem %s297_s19, 32 }
  0x17   : > { %p1562_p0 = scmp.ne.s32.totalorder %s297_s19, %s1561_s29  ;;  %p1569_p7 = scmp.lt.s32.totalorder %s297_s19, %s297_s19 }
  0x18   : > { %p1570_p8 = scmp.lt.s32.totalorder %s1568_s30, %s1561_s29 }
  0x19   : > { %p1564_p1 = pnand %p1562_p0, %p1526_p6 }
  0x1a   : > { %p1571_p2 = por %p1570_p8, %p1569_p7 }
  0x1b   : > { %p1565_p4 = pneg %p1564_p1 }
  0x1d   : > { %p1572_p10 = pnand %p1571_p2, %p1565_p4 }
  0x1f   : > { %1575 = shalt.err (!%p1572_p10)
}
  0x20   : > { %1455 = dma.hbm_to_vmem [thread:$0]  (!%p1735_p5), %s1957_s5, 16, %s297_s19, [#allocation3]  }
  0x21   : > { %s1587_s15 = scalar_lea.vmem %s1739_s21, 16  ;;  %s1594_s16 = scalar_lea.vmem %s1739_s21, 32 }
  0x22   : > { %p1588_p9 = scmp.ne.s32.totalorder %s1739_s21, %s1587_s15  ;;  %p1595_p2 = scmp.lt.s32.totalorder %s1739_s21, %s1739_s21 }
  0x23   : > { %p1596_p13 = scmp.lt.s32.totalorder %s1594_s16, %s1587_s15 }
  0x24   : > { %p1590_p11 = pnand %p1588_p9, %p1526_p6 }
  0x25   : > { %p1597_p0 = por %p1596_p13, %p1595_p2 }
  0x26   : > { %p1591_p12 = pneg %p1590_p11 }
  0x28   : > { %p1598_p1 = pnand %p1597_p0, %p1591_p12 }
  0x2a   : > { %1601 = shalt.err (!%p1598_p1)
}
  0x2b   : > { %1461 = dma.hbm_to_vmem [thread:$0]  (!%p1735_p5), %s1960_s8, 16, %s1739_s21, [#allocation5]  }
  0x2c   : > { %s1613_s19 = scalar_lea.vmem %s1741_s24, 16  ;;  %s1620_s23 = scalar_lea.vmem %s1741_s24, 32 }
  0x2d   : > { %p1614_p4 = scmp.ne.s32.totalorder %s1741_s24, %s1613_s19  ;;  %p1621_p10 = scmp.lt.s32.totalorder %s1741_s24, %s1741_s24 }
  0x2e   : > { %p1622_p9 = scmp.lt.s32.totalorder %s1620_s23, %s1613_s19 }
  0x2f   : > { %p1616_p7 = pnand %p1614_p4, %p1526_p6 }
  0x30   : > { %p1623_p11 = por %p1622_p9, %p1621_p10 }
  0x31   : > { %p1617_p8 = pneg %p1616_p7 }
  0x33   : > { %p1624_p12 = pnand %p1623_p11, %p1617_p8 }
  0x35   : > { %1627 = shalt.err (!%p1624_p12)
}
  0x36   : > { %1464 = dma.hbm_to_vmem [thread:$0]  (!%p1735_p5), %s1961_s9, 16, %s1741_s24, [#allocation8]  }
  0x37   : > { %359 = sbr.rel (%p1727_p3) target bundleno = 1787 (0x6fb), region = 60  ;;  %p1966_p6 = scmp.eq.s32.totalorder (!%p1727_p3), %s1722_s14, 0 }
  0x3c   : > { %1633 = dma.done.wait (%p1966_p6), [#allocation3], 16   ;;  %p1967_p2 = pmov %p1966_p6 }
  0x3e   : > { %1635 = vsyncadd (%p1967_p2), [#allocation3], 4294967280  ;;  %p1968_p13 = pmov %p1967_p2 }
  0x3f   : > { %p1969_p0 = pmov %p1967_p2 }
  0x40   : > { %1637 = dma.done.wait (%p1968_p13), [#allocation5], 32  }
  0x41   : > { %1639 = vsyncadd (%p1969_p0), [#allocation5], 4294967264  ;;  %p1970_p1 = pmov %p1969_p0 }
  0x42   : > { %p1971_p5 = pmov %p1969_p0 }
  0x43   : > { %1641 = dma.done.wait (%p1970_p1), [#allocation8], 16  }
  0x44   : > { %1643 = vsyncadd (%p1971_p5), [#allocation8], 4294967280  ;;  %p411_p3 = scmp.lt.s32.totalorder %s1722_s14, 1  ;;  %v1652_v0 = vmov 0.0   ;;  %vm1653_vm0 = vmmov 0   ;;  %v1494_v1 = vld [vmem:[%s1954_s2 + $0x18] sm:$0xff]  }
  0x45   : > { %1352 = vmatprep.subr.bf16.mxu0 %v1652_v0  ;;  %1360 = vmatprep.mubr.msk.bf16.mxu0 %vm1653_vm0, %v1652_v0  ;;  %v1495_v2 = vld [vmem:[%s1954_s2 + $0x10] sm:$0xff]   ;;  %v1496_v3 = vld [vmem:[%s1954_s2 + $0x8] sm:$0xff]   ;;  %v1497_v7 = vld [vmem:[%s1954_s2] sm:$0xff]   ;;  %vm467_vm1 = vcmask 523264   ;;  %s1654_s30 = smov 112   ;;  %s1656_s12 = smov 32  }
  0x46   : > { %s1973_s14 = smov (!%p411_p3, %s1722_s14), 1  ;;  %1364 = vmatprep.subr.bf16.mxu1 %v1652_v0  ;;  %1372 = vmatprep.mubr.msk.bf16.mxu1 %vm1653_vm0, %v1652_v0  ;;  %v1498_v9 = vld [vmem:[%s1956_s4 + $0x18] sm:$0xff]   ;;  %v1499_v10 = vld [vmem:[%s1956_s4 + $0x10] sm:$0xff]   ;;  %v1500_v11 = vld [vmem:[%s1956_s4 + $0x8] sm:$0xff]   ;;  %s1657_s15 = smov 48   ;;  %vm598_vm2 = vcmask 130048  }
  0x47   : > { %s1811_s17 = sshll.u32 %s1973_s14, 3  ;;  %1353 = vmatpush3.bf16.msra.mxu0 %v1494_v1  ;;  %1365 = vmatpush3.bf16.msra.mxu1 %v1498_v9  ;;  %v1501_v12 = vld [vmem:[%s1956_s4] sm:$0xff]   ;;  %s1658_s14 = smov 16   ;;  %vm662_vm3 = vcmask 1043456   ;;  %vm645_vm4 = vcmask 64512   ;;  %vm1050_vm5 = vcmask 261120  }
  0x48   : > { %s414_s28 = scalar_lea.vmem %s1952_s0, %s1811_s17  ;;  %s418_s11 = scalar_lea.vmem %s1953_s1, %s1811_s17  ;;  %1354 = vmatprep.subr.bf16.mxu0 %v1652_v0  ;;  %1366 = vmatprep.subr.bf16.mxu1 %v1652_v0  ;;  %v1291_v14 = vld [vmem:[%s1955_s3] ss:$0 sm:$0xff]  ;;  %vm1052_vm6 = vcmask 392192  }
  0x49   : > { %v1831_v4 = vld [vmem:[%s414_s28] sm:$0xff]  ;;  %s1659_s16 = smov 96   ;;  %s1660_s18 = smov 80  }
  0x4a   : > { %v425_v5 = vld [vmem:[%s418_s11] sm:$0xff]  ;;  %v511_v13 = vpack.c.bf16 %v1831_v4, %v1831_v4  ;;  %s1655_s11 = smov 64   ;;  %s422_s29 = scalar_lea.vmem %s1962_s10, %s1811_s17 }
  0x4b   : > { %1355 = vmatpush3.bf16.msra.mxu0 %v1495_v2  ;;  %v426_v6 = vadd.f32 %v425_v5, %v1831_v4  ;;  %1367 = vmatpush3.bf16.msra.mxu1 %v1499_v10  ;;  %v1297_v36 = vld [vmem:[#allocation2] ss:$0 sm:$0xff] }
  0x4c   : > { %1356 = vmatprep.subr.bf16.mxu0 %v1652_v0  ;;  %1368 = vmatprep.subr.bf16.mxu1 %v1652_v0 }
  0x4d   : > { %v427_v8 = vpack.c.bf16 %v426_v6, %v426_v6 }
  0x4f   : > { %1357 = vmatpush3.bf16.msra.mxu0 %v1496_v3  ;;  %1369 = vmatpush3.bf16.msra.mxu1 %v1500_v11 }
  0x50   : > { %1358 = vmatprep.subr.bf16.mxu0 %v1652_v0  ;;  %1370 = vmatprep.subr.bf16.mxu1 %v1652_v0 }
  0x53   : > { %1359 = vmatpush3.bf16.msra.mxu0 %v1497_v7  ;;  %1371 = vmatpush3.bf16.msra.mxu1 %v1501_v12 }
  0x54   : > { %1388 = vmatprep.subr.bf16.mxu0 %v1652_v0  ;;  %1376 = vmatprep.subr.bf16.mxu1 %v1652_v0 }
  0x56   : > { %1361 = vmatmul.mubr.msk.bf16.vlgmr.msra.gmra.mxu0 %vm467_vm1, %v427_v8  ;;  %1373 = vmatmul.mubr.msk.bf16.vlgmr.msra.gmra.mxu1 %vm467_vm1, %v511_v13 }
  0x57   : > { %1390 = vmatprep.mubr.msk.bf16.mxu0 %vm1653_vm0, %v1652_v0  ;;  %1378 = vmatprep.mubr.msk.bf16.mxu1 %vm1653_vm0, %v1652_v0 }
 0x116   : > { %v505_v15 = vpop.f32.mrf.mxu0  ;;  %v588_v32 = vpop.f32.mrf.mxu1 }
 0x117   : > { %v506_v16 = vadd.f32 %v1291_v14, %v505_v15  ;;  %v589_v37 = vadd.f32 %v1297_v36, %v588_v32 }
 0x118   : > { %v1362_v17 = vpop.f32.mrf.mxu0  ;;  %v1374_v33 = vpop.f32.mrf.mxu1 }
 0x119   : > { %v594_v18 = vpack.c.bf16 %v506_v16, %v506_v16  ;;  %v658_v38 = vpack.c.bf16 %v589_v37, %v589_v37 }
 0x11a   : > { %v508_v19 = vpop.f32.mrf.mxu0  ;;  %v591_v34 = vpop.f32.mrf.mxu1 }
 0x11b   : > { %706 = vrot.lane.b32.xlu1 %v594_v18, %s1654_s30  ;;  %596 = vrot.lane.b32.xlu0 %v594_v18, %s1655_s11  ;;  %v664_v39 = vsel %vm662_vm3, %v658_v38, 0 }
 0x11c   : > { %v1363_v20 = vpop.f32.mrf.mxu0  ;;  %v1375_v35 = vpop.f32.mrf.mxu1 }
 0x11f   : > { %819 = vrot.lane.b32.xlu1 %v594_v18, %s1656_s12  ;;  %708 = vrot.lane.b32.xlu0 %v594_v18, %s1657_s15 }
 0x123   : > { %929 = vrot.lane.b32.xlu1 %v594_v18, %s1658_s14  ;;  %817 = vrot.lane.b32.xlu0 %v594_v18, %s1659_s16 }
 0x127   : > { %927 = vrot.lane.b32.xlu0 %v594_v18, %s1660_s18 }
 0x18d   : > { %v597_v21 = vpop.permute.xlu0 %596  ;;  %v707_v23 = vpop.permute.xlu1 %706 }
 0x18e   : > { %v603_v22 = vsel %vm598_vm2, %v597_v21, 0 }
 0x18f   : > { %1377 = vmatpush3.bf16.xpose.msra.mxu1 %v603_v22 }
 0x190   : > { %1382 = vmatprep.subr.bf16.mxu1 %v1652_v0 }
 0x191   : > { %v709_v24 = vpop.permute.xlu0 %708  ;;  %v820_v26 = vpop.permute.xlu1 %819 }
 0x192   : > { %v714_v25 = vsel %vm598_vm2, %v709_v24, 0  ;;  %v825_v27 = vsel %vm598_vm2, %v820_v26, 0 }
 0x193   : > { %1389 = vmatpush3.bf16.xpose.msra.mxu0 %v714_v25 }
 0x194   : > { %1400 = vmatprep.subr.bf16.mxu0 %v1652_v0 }
 0x195   : > { %v930_v28 = vpop.permute.xlu1 %929  ;;  %v818_v29 = vpop.permute.xlu0 %817 }
 0x196   : > { %1379 = vmatmul.mubr.msk.bf16.vlgmr.msra.gmra.mxu1 %vm598_vm2, %v594_v18  ;;  %v935_v30 = vsel %vm598_vm2, %v930_v28, 0 }
 0x197   : > { %1384 = vmatprep.mubr.msk.bf16.mxu1 %vm1653_vm0, %v1652_v0  ;;  %1383 = vmatpush3.bf16.msra.mxu1 %v664_v39 }
 0x198   : > { %1394 = vmatprep.subr.bf16.mxu1 %v1652_v0 }
 0x199   : > { %v928_v31 = vpop.permute.xlu0 %927 }
 0x19a   : > { %1391 = vmatmul.mubr.msk.bf16.vlgmr.msra.gmra.mxu0 %vm598_vm2, %v707_v23 }
 0x19b   : > { %1401 = vmatpush3.bf16.xpose.msra.mxu0 %v825_v27  ;;  %1402 = vmatprep.mubr.msk.bf16.mxu0 %vm1653_vm0, %v1652_v0 }
 0x19c   : > { %1412 = vmatprep.subr.bf16.mxu0 %v1652_v0 }
 0x1a2   : > { %1403 = vmatmul.mubr.msk.bf16.vlgmr.msra.gmra.mxu0 %vm598_vm2, %v818_v29 }
 0x1a3   : > { %1413 = vmatpush3.bf16.xpose.msra.mxu0 %v935_v30  ;;  %1414 = vmatprep.mubr.msk.bf16.mxu0 %vm1653_vm0, %v1652_v0 }
 0x1a4   : > { %1424 = vmatprep.subr.bf16.mxu0 %v1652_v0 }
 0x1aa   : > { %1415 = vmatmul.mubr.msk.bf16.vlgmr.msra.gmra.mxu0 %vm598_vm2, %v928_v31 }
 0x1ab   : > { %1432 = vmatprep.mubr.msk.bf16.mxu0 %vm1653_vm0, %v1652_v0 }
 0x256   : > { %v639_v40 = vpop.f32.mrf.mxu1 }
 0x257   : > { %v646_v41 = vsel %vm645_vm4, %v639_v40, -inf }
 0x258   : > { %647 = vmax.xlane.f32.xlu1 %v646_v41  ;;  %v1380_v42 = vpop.f32.mrf.mxu1 }
 0x25a   : > { %v642_v43 = vpop.f32.mrf.mxu1  ;;  %v750_v44 = vpop.f32.mrf.mxu0 }
 0x25b   : > { %v756_v45 = vsel %vm645_vm4, %v750_v44, -inf  ;;  %v1502_v43 = vld [vmem:[%s1958_s6 + $0x18] sm:$0xff]  }
 0x25c   : > { %v1381_v46 = vpop.f32.mrf.mxu1  ;;  %757 = vmax.xlane.f32.xlu0 %v756_v45  ;;  %v1392_v47 = vpop.f32.mrf.mxu0  ;;  %1425 = vmatpush3.bf16.msra.mxu0 %v1502_v43  ;;  %v1503_v45 = vld [vmem:[%s1958_s6 + $0x10] sm:$0xff]  }
 0x25d   : > { %1426 = vmatprep.subr.bf16.mxu0 %v1652_v0 }
 0x25e   : > { %v753_v48 = vpop.f32.mrf.mxu0 }
 0x25f   : > { %v1504_v48 = vld [vmem:[%s1958_s6 + $0x8] sm:$0xff]  }
 0x260   : > { %v1393_v49 = vpop.f32.mrf.mxu0  ;;  %1427 = vmatpush3.bf16.msra.mxu0 %v1503_v45 }
 0x261   : > { %1428 = vmatprep.subr.bf16.mxu0 %v1652_v0 }
 0x262   : > { %v861_v50 = vpop.f32.mrf.mxu0 }
 0x263   : > { %v867_v51 = vsel %vm645_vm4, %v861_v50, -inf }
 0x264   : > { %868 = vmax.xlane.f32.xlu0 %v867_v51  ;;  %v1404_v52 = vpop.f32.mrf.mxu0  ;;  %1429 = vmatpush3.bf16.msra.mxu0 %v1504_v48 }
 0x265   : > { %1430 = vmatprep.subr.bf16.mxu0 %v1652_v0 }
 0x266   : > { %v864_v53 = vpop.f32.mrf.mxu0 }
 0x268   : > { %v1405_v54 = vpop.f32.mrf.mxu0 }
 0x26a   : > { %v971_v55 = vpop.f32.mrf.mxu0 }
 0x26b   : > { %v977_v56 = vsel %vm645_vm4, %v971_v55, -inf }
 0x26c   : > { %978 = vmax.xlane.f32.xlu1 %v977_v56  ;;  %v1416_v57 = vpop.f32.mrf.mxu0 }
 0x26e   : > { %v974_v58 = vpop.f32.mrf.mxu0 }
 0x270   : > { %v1417_v59 = vpop.f32.mrf.mxu0 }
 0x2e1   : > { %v648_v60 = vpop.xlane.xlu1 %647 }
 0x2e2   : > { %v649_v61 = vsub.f32 %v639_v40, %v648_v60 }
 0x2e4   : > { %v650_v62 = vmul.f32 1.442695, %v649_v61 }
 0x2e5   : > { %v758_v63 = vpop.xlane.xlu0 %757 }
 0x2e6   : > { %1506 = vpow2.f32 %v650_v62  ;;  %v759_v1 = vsub.f32 %v750_v44, %v758_v63 }
 0x2e8   : > { %v760_v2 = vmul.f32 1.442695, %v759_v1 }
 0x2ea   : > { %1508 = vpow2.f32 %v760_v2 }
 0x2ed   : > { %v869_v3 = vpop.xlane.xlu0 %868 }
 0x2ee   : > { %v870_v5 = vsub.f32 %v861_v50, %v869_v3  ;;  %v1311_v3 = vld [vmem:[#allocation4] ss:$0 sm:$0xff] }
 0x2f0   : > { %v871_v6 = vmul.f32 1.442695, %v870_v5 }
 0x2f2   : > { %1510 = vpow2.f32 %v871_v6 }
 0x2f3   : > { %v1507_v7 = vpop.eup %1506 }
 0x2f4   : > { %v652_v8 = vsel %vm645_vm4, %v1507_v7, 0.0 }
 0x2f5   : > { %653 = vadd.xlane.f32.xlu0 %v652_v8  ;;  %v979_v13 = vpop.xlane.xlu1 %978 }
 0x2f6   : > { %v980_v14 = vsub.f32 %v971_v55, %v979_v13  ;;  %v1505_v55 = vld [vmem:[%s1958_s6] sm:$0xff]  }
 0x2f7   : > { %v1509_v9 = vpop.eup %1508  ;;  %1431 = vmatpush3.bf16.msra.mxu0 %v1505_v55 }
 0x2f8   : > { %v762_v10 = vsel %vm645_vm4, %v1509_v9, 0.0  ;;  %v981_v15 = vmul.f32 1.442695, %v980_v14 }
 0x2f9   : > { %763 = vadd.xlane.f32.xlu1 %v762_v10 }
 0x2fa   : > { %1512 = vpow2.f32 %v981_v15 }
 0x2ff   : > { %v1511_v11 = vpop.eup %1510 }
 0x300   : > { %v873_v12 = vsel %vm645_vm4, %v1511_v11, 0.0 }
 0x301   : > { %874 = vadd.xlane.f32.xlu0 %v873_v12 }
 0x307   : > { %v1513_v16 = vpop.eup %1512 }
 0x308   : > { %v983_v17 = vsel %vm645_vm4, %v1513_v16, 0.0 }
 0x30a   : > { %879 = vrot.lane.b32.xlu1 %v658_v38, %s1659_s16 }
 0x317   : > { %769 = vrot.lane.b32.xlu0 %v658_v38, %s1654_s30 }
 0x32e   : > { %984 = vadd.xlane.f32.xlu1 %v983_v17 }
 0x33f   : > { %989 = vrot.lane.b32.xlu1 %v658_v38, %s1660_s18 }
 0x37e   : > { %v654_v18 = vpop.xlane.xlu0 %653 }
 0x37f   : > { %1514 = vrcp.f32 %v654_v18 }
 0x382   : > { %v764_v19 = vpop.xlane.xlu1 %763 }
 0x383   : > { %1516 = vrcp.f32 %v764_v19 }
 0x386   : > { %v880_v28 = vpop.permute.xlu1 %879 }
 0x387   : > { %v885_v31 = vsel %vm662_vm3, %v880_v28, 0 }
 0x38a   : > { %v875_v20 = vpop.xlane.xlu0 %874 }
 0x38b   : > { %1518 = vrcp.f32 %v875_v20 }
 0x38c   : > { %v1515_v21 = vpop.eup %1514 }
 0x38d   : > { %v656_v22 = vmul.f32 %v1515_v21, %v1507_v7  ;;  %v1317_v21 = vld [vmem:[#allocation6] ss:$0 sm:$0xff] }
 0x38e   : > { %v770_v23 = vpop.permute.xlu0 %769 }
 0x38f   : > { %v775_v24 = vsel %vm662_vm3, %v770_v23, 0  ;;  %v657_v25 = vpack.c.bf16 %v656_v22, %v656_v22  ;;  %v1318_v22 = vld [vmem:[#allocation7] ss:$0 sm:$0xff] }
 0x390   : > { %v1517_v26 = vpop.eup %1516 }
 0x391   : > { %1385 = vmatmul.mubr.msk.bf16.vlgmr.msra.gmra.mxu1 %vm645_vm4, %v657_v25  ;;  %v766_v27 = vmul.f32 %v1517_v26, %v1509_v9 }
 0x392   : > { %1395 = vmatpush3.bf16.msra.mxu1 %v775_v24  ;;  %1396 = vmatprep.mubr.msk.bf16.mxu1 %vm1653_vm0, %v1652_v0 }
 0x393   : > { %1406 = vmatprep.subr.bf16.mxu1 %v1652_v0  ;;  %v767_v29 = vpack.c.bf16 %v766_v27, %v766_v27 }
 0x398   : > { %v1519_v30 = vpop.eup %1518 }
 0x399   : > { %1397 = vmatmul.mubr.msk.bf16.vlgmr.msra.gmra.mxu1 %vm645_vm4, %v767_v29  ;;  %v877_v32 = vmul.f32 %v1519_v30, %v1511_v11 }
 0x39a   : > { %1407 = vmatpush3.bf16.msra.mxu1 %v885_v31  ;;  %1408 = vmatprep.mubr.msk.bf16.mxu1 %vm1653_vm0, %v1652_v0 }
 0x39b   : > { %1418 = vmatprep.subr.bf16.mxu1 %v1652_v0  ;;  %v878_v33 = vpack.c.bf16 %v877_v32, %v877_v32 }
 0x3a1   : > { %1409 = vmatmul.mubr.msk.bf16.vlgmr.msra.gmra.mxu1 %vm645_vm4, %v878_v33 }
 0x3a2   : > { %1420 = vmatprep.mubr.msk.bf16.mxu1 %vm1653_vm0, %v1652_v0 }
 0x3b7   : > { %v985_v34 = vpop.xlane.xlu1 %984 }
 0x3b8   : > { %1520 = vrcp.f32 %v985_v34 }
 0x3bb   : > { %v990_v35 = vpop.permute.xlu1 %989 }
 0x3bc   : > { %v995_v36 = vsel %vm662_vm3, %v990_v35, 0 }
 0x3bd   : > { %1419 = vmatpush3.bf16.msra.mxu1 %v995_v36 }
 0x3c5   : > { %v1521_v37 = vpop.eup %1520 }
 0x3c6   : > { %v987_v38 = vmul.f32 %v1521_v37, %v1513_v16 }
 0x3c8   : > { %v988_v39 = vpack.c.bf16 %v987_v38, %v987_v38 }
 0x3ca   : > { %1421 = vmatmul.mubr.msk.bf16.vlgmr.msra.gmra.mxu1 %vm645_vm4, %v988_v39 }
 0x451   : > { %v700_v40 = vpop.f32.mrf.mxu1 }
 0x453   : > { %v1386_v41 = vpop.f32.mrf.mxu1 }
 0x455   : > { %v703_v42 = vpop.f32.mrf.mxu1 }
 0x457   : > { %v1387_v44 = vpop.f32.mrf.mxu1 }
 0x459   : > { %v811_v46 = vpop.f32.mrf.mxu1 }
 0x45a   : > { %1038 = vrot.lane.b32.xlu0 %v811_v46, %s1658_s14 }
 0x45b   : > { %v1398_v47 = vpop.f32.mrf.mxu1 }
 0x45d   : > { %v814_v49 = vpop.f32.mrf.mxu1 }
 0x45f   : > { %v1399_v50 = vpop.f32.mrf.mxu1 }
 0x461   : > { %v921_v51 = vpop.f32.mrf.mxu1 }
 0x462   : > { %1042 = vrot.lane.b32.xlu1 %v921_v51, %s1656_s12 }
 0x463   : > { %v1410_v52 = vpop.f32.mrf.mxu1 }
 0x465   : > { %v924_v53 = vpop.f32.mrf.mxu1 }
 0x467   : > { %v1411_v54 = vpop.f32.mrf.mxu1 }
 0x48a   : > { %v1031_v56 = vpop.f32.mrf.mxu1 }
 0x48b   : > { %1046 = vrot.lane.b32.xlu0 %v1031_v56, %s1657_s15 }
 0x48c   : > { %v1422_v57 = vpop.f32.mrf.mxu1 }
 0x48e   : > { %v1034_v58 = vpop.f32.mrf.mxu1 }
 0x490   : > { %v1423_v59 = vpop.f32.mrf.mxu1 }
 0x4cc   : > { %v1039_v60 = vpop.permute.xlu0 %1038 }
 0x4cd   : > { %v1049_v61 = vsel %vm598_vm2, %v700_v40, %v1039_v60 }
 0x4d4   : > { %v1043_v0 = vpop.permute.xlu1 %1042 }
 0x4d5   : > { %v1051_v62 = vsel %vm1050_vm5, %v1049_v61, %v1043_v0 }
 0x4fd   : > { %v1047_v63 = vpop.permute.xlu0 %1046 }
 0x4fe   : > { %v1053_v1 = vsel %vm1052_vm6, %v1051_v62, %v1047_v63 }
 0x4ff   : > { %v1054_v2 = vpack.c.bf16 %v1053_v1, %v1053_v1 }
 0x501   : > { %1433 = vmatmul.mubr.msk.bf16.vlgmr.msra.gmra.mxu0 %vm467_vm1, %v1054_v2 }
 0x5c1   : > { %v1131_v5 = vpop.f32.mrf.mxu0 }
 0x5c2   : > { %v1132_v6 = vadd.f32 %v1311_v3, %v1131_v5 }
 0x5c3   : > { %v1434_v7 = vpop.f32.mrf.mxu0 }
 0x5c4   : > { %v1137_v8 = vadd.f32 %v1132_v6, %v1831_v4 }
 0x5c5   : > { %v1134_v9 = vpop.f32.mrf.mxu0 }
 0x5c6   : > { %v1140_v10 = vsel %vm467_vm1, %v1137_v8, 0.0 }
 0x5c7   : > { %1141 = vadd.xlane.f32.xlu1 %v1140_v10  ;;  %v1435_v11 = vpop.f32.mrf.mxu0 }
 0x650   : > { %v1142_v12 = vpop.xlane.xlu1 %1141 }
 0x651   : > { %v1144_v13 = vmul.f32 0.015625, %v1142_v12 }
 0x653   : > { %v1145_v14 = vsub.f32 %v1137_v8, %v1144_v13 }
 0x655   : > { %v1146_v15 = vmul.f32 %v1145_v14, %v1145_v14 }
 0x657   : > { %v1147_v16 = vsel %vm467_vm1, %v1146_v15, 0.0 }
 0x658   : > { %1148 = vadd.xlane.f32.xlu0 %v1147_v16 }
 0x6e1   : > { %v1149_v17 = vpop.xlane.xlu0 %1148 }
 0x6e2   : > { %v1150_v18 = vmul.f32 0.015625, %v1149_v17 }
 0x6e4   : > { %v1151_v19 = vadd.f32 1e-05, %v1150_v18 }
 0x6e6   : > { %1522 = vrsqrt.f32 %v1151_v19 }
 0x6f3   : > { %v1523_v20 = vpop.eup %1522 }
 0x6f4   : > { %v1153_v4 = vmul.f32 %v1523_v20, %v1145_v14 }
 0x6f6   : > { %v1160_v23 = vmul.f32 %v1317_v21, %v1153_v4 }
 0x6f8   : > { %v1167_v24 = vadd.f32 %v1318_v22, %v1160_v23 }
 0x6fa   : > { %1168 = vst.msk [vmem:[%s422_s29] sm:$0xff] %vm467_vm1, %v1167_v24 }
 0x6fb PF: > { %s23_s13 = sadd.s32 1, %s1646_s13  }
 0x6fc   : > { %p20_p4 = scmp.ge.s32.totalorder %s23_s13, 4  }
 0x6fe   :  { %22 = sbr.rel (!%p20_p4) target bundleno = 3 (0x3), region = 110 }
 0x703   :  { %1188 = vsyncpa [#allocation3], 1 }
 0x704   :  { %1190 = vsyncpa [#allocation3 + $0x1], 1 }
 0x705   :  { %1191 = vsyncpa [#allocation5], 1 }
 0x706   :  { %1192 = vsyncpa [#allocation8], 1 }

// kernel: deformable_decoder_layer_forward.6
= control target key start
LH: loop header
LB: loop body
LE: loop exit
PB: predicated region body
PF: predicated region fallthrough
CT: control target
= control target key end

     0   :  { %v293_v0 = vmov 0.0   ;;  %vm294_vm0 = vmmov 0   ;;  %vm67_vm1 = vcmask 523264   ;;  %vm112_vm2 = vcmask 785920   ;;  %s295_s15 = smov 64   ;;  %s374_s2 = inlined_call_operand.vmem [shape: bf16[64,96], index: 2, kind: input, shape index: {}]   ;;  %s375_s0 = inlined_call_operand.vmem [shape: f32[16,64], index: 0, kind: input, shape index: {}]   ;;  %s376_s1 = inlined_call_operand.vmem [shape: f32[16,64], index: 1, kind: input, shape index: {}]   ;;  %s377_s3 = inlined_call_operand.vmem [shape: f32[1,96], index: 3, kind: input, shape index: {}]   ;;  %s378_s4 = inlined_call_operand.vmem [shape: f32[32,32], index: 4, kind: input, shape index: {}]   ;;  %s379_s5 = inlined_call_operand.vmem [shape: f32[16,96], index: 5, kind: output, shape index: {}]  }
   0x1   :  { %255 = vmatprep.subr.bf16.mxu0 %v293_v0  ;;  %v281_v1 = vld [vmem:[%s374_s2 + $0x18] sm:$0xff]   ;;  %263 = vmatprep.mubr.msk.bf16.mxu0 %vm294_vm0, %v293_v0  ;;  %v282_v2 = vld [vmem:[%s374_s2 + $0x10] sm:$0xff]   ;;  %v283_v3 = vld [vmem:[%s374_s2 + $0x8] sm:$0xff]   ;;  %vm135_vm3 = vcmask 261120   ;;  %vm229_vm4 = vcmask 785408  }
   0x2   :  { %256 = vmatpush3.bf16.msra.mxu0 %v281_v1  ;;  %v21_v4 = vld [vmem:[%s375_s0] sm:$0xff]  ;;  %v22_v5 = vld [vmem:[%s375_s0 + $0x8] sm:$0xff]  ;;  %v128_v21 = vld [vmem:[%s378_s4 + $0x18] sm:$0xff] }
   0x3   :  { %257 = vmatprep.subr.bf16.mxu0 %v293_v0  ;;  %v23_v6 = vld [vmem:[%s376_s1] sm:$0xff]  ;;  %v24_v7 = vld [vmem:[%s376_s1 + $0x8] sm:$0xff]  ;;  %v127_v22 = vld [vmem:[%s378_s4 + $0x10] sm:$0xff]  ;;  %267 = vmatprep.subr.mxu1 %v128_v21 }
   0x4   :  { %v25_v8 = vadd.f32 %v23_v6, %v21_v4  ;;  %v26_v9 = vadd.f32 %v24_v7, %v22_v5  ;;  %v284_v10 = vld [vmem:[%s374_s2] sm:$0xff]   ;;  %268 = vmatpush3.msra.mxu1 %v128_v21  ;;  %v126_v28 = vld [vmem:[%s378_s4 + $0x8] sm:$0xff] }
   0x5   :  { %v236_v12 = vld [vmem:[%s377_s3] ss:$0 sm:$0xff]  ;;  %269 = vmatprep.subr.mxu1 %v127_v22 }
   0x6   :  { %258 = vmatpush3.bf16.msra.mxu0 %v282_v2  ;;  %v27_v11 = vpack.c.bf16 %v26_v9, %v25_v8  ;;  %270 = vmatpush3.msra.mxu1 %v127_v22  ;;  %v125_v29 = vld [vmem:[%s378_s4] sm:$0xff] }
   0x7   :  { %259 = vmatprep.subr.bf16.mxu0 %v293_v0  ;;  %271 = vmatprep.subr.mxu1 %v126_v28 }
   0x8   :  { %272 = vmatpush3.msra.mxu1 %v126_v28 }
   0x9   :  { %273 = vmatprep.subr.mxu1 %v125_v29 }
   0xa   :  { %260 = vmatpush3.bf16.msra.mxu0 %v283_v3  ;;  %274 = vmatpush3.msra.mxu1 %v125_v29 }
   0xb   :  { %261 = vmatprep.subr.bf16.mxu0 %v293_v0 }
   0xe   :  { %262 = vmatpush3.bf16.msra.mxu0 %v284_v10 }
  0x11   :  { %264 = vmatmul.mubr.msk.bf16.vlgmr.msra.gmra.mxu0 %vm67_vm1, %v27_v11 }
  0xd1   :  { %v105_v13 = vpop.f32.mrf.mxu0 }
  0xd2   :  { %v106_v14 = vadd.f32 %v236_v12, %v105_v13 }
  0xd3   :  { %v265_v15 = vpop.f32.mrf.mxu0 }
  0xd4   :  { %v113_v16 = vsel %vm112_vm2, %v106_v14, -inf }
  0xd5   :  { %114 = vmax.xlane.f32.xlu0 %v113_v16  ;;  %v108_v17 = vpop.f32.mrf.mxu0 }
  0xd6   :  { %v109_v18 = vadd.f32 %v236_v12, %v108_v17 }
  0xd7   :  { %v266_v19 = vpop.f32.mrf.mxu0 }
  0xd8   :  { %v116_v20 = vsel %vm112_vm2, %v109_v18, -inf }
  0xd9   :  { %117 = vmax.xlane.f32.xlu0 %v116_v20 }
 0x15e   :  { %v115_v23 = vpop.xlane.xlu0 %114 }
 0x15f   :  { %v119_v24 = vsub.f32 %v106_v14, %v115_v23 }
 0x161   :  { %v121_v25 = vmul.f32 1.442695, %v119_v24 }
 0x162   :  { %v118_v26 = vpop.xlane.xlu0 %117 }
 0x163   :  { %285 = vpow2.f32 %v121_v25  ;;  %v120_v27 = vsub.f32 %v109_v18, %v118_v26 }
 0x165   :  { %v123_v30 = vmul.f32 1.442695, %v120_v27 }
 0x167   :  { %287 = vpow2.f32 %v123_v30 }
 0x170   :  { %v286_v31 = vpop.eup %285 }
 0x171   :  { %131 = vrot.lane.b32.xlu1 %v286_v31, %s295_s15 }
 0x174   :  { %v288_v32 = vpop.eup %287 }
 0x175   :  { %133 = vrot.lane.b32.xlu1 %v288_v32, %s295_s15 }
 0x1e3   :  { %v132_v33 = vpop.permute.xlu1 %131 }
 0x1e4   :  { %275 = vmatprep.mubr.msk.f32.mxu1 %vm135_vm3, %v132_v33 }
 0x1e7   :  { %v134_v34 = vpop.permute.xlu1 %133 }
 0x1e8   :  { %276 = vmatmul.mubr.msk.f32.vlgmr.msra.gmra.mxu1 %vm135_vm3, %v134_v34 }
 0x2a8   :  { %v277_v35 = vpop.f32.mrf.mxu1 }
 0x2a9   :  { %289 = vrcp.f32 %v277_v35 }
 0x2aa   :  { %v206_v36 = vpop.f32.mrf.mxu1 }
 0x2ab   :  { %291 = vrcp.f32 %v206_v36 }
 0x2b6   :  { %v290_v37 = vpop.eup %289 }
 0x2b7   :  { %221 = vrot.lane.b32.xlu1 %v290_v37, %s295_s15 }
 0x2b8   :  { %v292_v38 = vpop.eup %291 }
 0x2b9   :  { %219 = vrot.lane.b32.xlu0 %v292_v38, %s295_s15 }
 0x329   :  { %v222_v39 = vpop.permute.xlu1 %221 }
 0x32a   :  { %v226_v40 = vmul.f32 %v288_v32, %v222_v39 }
 0x32b   :  { %v220_v41 = vpop.permute.xlu0 %219 }
 0x32c   :  { %v228_v42 = vsel %vm67_vm1, %v109_v18, %v226_v40  ;;  %v225_v43 = vmul.f32 %v286_v31, %v220_v41 }
 0x32d   :  { %231 = vst.msk [vmem:[%s379_s5 + $0x8] sm:$0xff] %vm229_vm4, %v228_v42 }
 0x32e   :  { %v227_v44 = vsel %vm67_vm1, %v106_v14, %v225_v43 }
 0x32f   :  { %230 = vst.msk [vmem:[%s379_s5] sm:$0xff] %vm229_vm4, %v227_v44 }

// kernel: deformable_decoder_layer_forward.5
= control target key start
LH: loop header
LB: loop body
LE: loop exit
PB: predicated region body
PF: predicated region fallthrough
CT: control target
= control target key end

     0   :  { %vm174_vm0 = vcmask 523264   ;;  %vm968_vm1 = vcmask 519168   ;;  %s2119_s1 = inlined_call_operand.vmem [shape: bf16[64,64], index: 1, kind: input, shape index: {}]   ;;  %s2120_s0 = inlined_call_operand.vmem [shape: f32[640,64], index: 0, kind: input, shape index: {}]   ;;  %s2121_s2 = inlined_call_operand.vmem [shape: f32[1,64], index: 2, kind: input, shape index: {}]   ;;  %s2122_s3 = inlined_call_operand.vmem [shape: bf16[640,64], index: 3, kind: output, shape index: {}]  }
   0x1   :  { %v1398_v0 = vld [vmem:[%s2119_s1 + $0x18] sm:$0xff]   ;;  %v1399_v1 = vld [vmem:[%s2119_s1 + $0x10] sm:$0xff]   ;;  %v1400_v2 = vld [vmem:[%s2119_s1 + $0x8] sm:$0xff]  }
   0x2   :  { %1302 = vmatprep.subr.bf16.mxu0 %v1398_v0  ;;  %1390 = vmatprep.subr.bf16.mxu1 %v1398_v0  ;;  %v15_v3 = vld [vmem:[%s2120_s0] sm:$0xff]  ;;  %v16_v4 = vld [vmem:[%s2120_s0 + $0x8] sm:$0xff]  ;;  %v17_v10 = vld [vmem:[%s2120_s0 + $0x10] sm:$0xff] }
   0x3   :  { %1303 = vmatpush3.bf16.msra.mxu0 %v1398_v0  ;;  %1394 = vmatpush3.bf16.msra.mxu1 %v1398_v0  ;;  %v55_v5 = vld [vmem:[%s2120_s0 + $0x140] sm:$0xff]  ;;  %v95_v6 = vpack.c.bf16 %v16_v4, %v15_v3  ;;  %v56_v7 = vld [vmem:[%s2120_s0 + $0x148] sm:$0xff]  ;;  %v18_v11 = vld [vmem:[%s2120_s0 + $0x18] sm:$0xff] }
   0x4   :  { %1304 = vmatprep.subr.bf16.mxu0 %v1399_v1  ;;  %1391 = vmatprep.subr.bf16.mxu1 %v1399_v1  ;;  %v115_v8 = vpack.c.bf16 %v56_v7, %v55_v5  ;;  %v1401_v9 = vld [vmem:[%s2119_s1] sm:$0xff]   ;;  %v57_v12 = vld [vmem:[%s2120_s0 + $0x150] sm:$0xff]  ;;  %v58_v13 = vld [vmem:[%s2120_s0 + $0x158] sm:$0xff]  ;;  %v96_v18 = vpack.c.bf16 %v18_v11, %v17_v10 }
   0x5   :  { %1310 = vmatprep.mubr.msk.bf16.mxu0 %vm174_vm0, %v95_v6  ;;  %v19_v14 = vld [vmem:[%s2120_s0 + $0x20] sm:$0xff]  ;;  %v20_v15 = vld [vmem:[%s2120_s0 + $0x28] sm:$0xff]  ;;  %v116_v19 = vpack.c.bf16 %v58_v13, %v57_v12  ;;  %v21_v22 = vld [vmem:[%s2120_s0 + $0x30] sm:$0xff] }
   0x6   :  { %1350 = vmatprep.mubr.msk.bf16.mxu1 %vm174_vm0, %v115_v8  ;;  %v59_v16 = vld [vmem:[%s2120_s0 + $0x160] sm:$0xff]  ;;  %v60_v17 = vld [vmem:[%s2120_s0 + $0x168] sm:$0xff]  ;;  %v97_v20 = vpack.c.bf16 %v20_v15, %v19_v14  ;;  %v22_v23 = vld [vmem:[%s2120_s0 + $0x38] sm:$0xff] }
   0x7   :  { %1305 = vmatpush3.bf16.msra.mxu0 %v1399_v1  ;;  %1395 = vmatpush3.bf16.msra.mxu1 %v1399_v1  ;;  %v117_v21 = vpack.c.bf16 %v60_v17, %v59_v16  ;;  %v61_v24 = vld [vmem:[%s2120_s0 + $0x170] sm:$0xff]  ;;  %v62_v25 = vld [vmem:[%s2120_s0 + $0x178] sm:$0xff]  ;;  %v23_v26 = vld [vmem:[%s2120_s0 + $0x40] sm:$0xff]  ;;  %v98_v30 = vpack.c.bf16 %v22_v23, %v21_v22 }
   0x8   :  { %1306 = vmatprep.subr.bf16.mxu0 %v1400_v2  ;;  %1392 = vmatprep.subr.bf16.mxu1 %v1400_v2  ;;  %v24_v27 = vld [vmem:[%s2120_s0 + $0x48] sm:$0xff]  ;;  %v63_v28 = vld [vmem:[%s2120_s0 + $0x180] sm:$0xff]  ;;  %v118_v31 = vpack.c.bf16 %v62_v25, %v61_v24  ;;  %v25_v34 = vld [vmem:[%s2120_s0 + $0x50] sm:$0xff] }
   0x9   :  { %v64_v29 = vld [vmem:[%s2120_s0 + $0x188] sm:$0xff]  ;;  %v99_v32 = vpack.c.bf16 %v24_v27, %v23_v26  ;;  %v26_v35 = vld [vmem:[%s2120_s0 + $0x58] sm:$0xff]  ;;  %v65_v36 = vld [vmem:[%s2120_s0 + $0x190] sm:$0xff] }
   0xa   :  { %v119_v33 = vpack.c.bf16 %v64_v29, %v63_v28  ;;  %v66_v37 = vld [vmem:[%s2120_s0 + $0x198] sm:$0xff]  ;;  %v27_v38 = vld [vmem:[%s2120_s0 + $0x60] sm:$0xff]  ;;  %v28_v39 = vld [vmem:[%s2120_s0 + $0x68] sm:$0xff]  ;;  %v100_v42 = vpack.c.bf16 %v26_v35, %v25_v34 }
   0xb   :  { %1307 = vmatpush3.bf16.msra.mxu0 %v1400_v2  ;;  %1396 = vmatpush3.bf16.msra.mxu1 %v1400_v2  ;;  %v67_v40 = vld [vmem:[%s2120_s0 + $0x1a0] sm:$0xff]  ;;  %v68_v41 = vld [vmem:[%s2120_s0 + $0x1a8] sm:$0xff]  ;;  %v120_v43 = vpack.c.bf16 %v66_v37, %v65_v36  ;;  %v101_v44 = vpack.c.bf16 %v28_v39, %v27_v38  ;;  %v29_v46 = vld [vmem:[%s2120_s0 + $0x70] sm:$0xff] }
   0xc   :  { %1308 = vmatprep.subr.bf16.mxu0 %v1401_v9  ;;  %1393 = vmatprep.subr.bf16.mxu1 %v1401_v9  ;;  %v121_v45 = vpack.c.bf16 %v68_v41, %v67_v40  ;;  %v30_v47 = vld [vmem:[%s2120_s0 + $0x78] sm:$0xff]  ;;  %v69_v48 = vld [vmem:[%s2120_s0 + $0x1b0] sm:$0xff]  ;;  %v31_v50 = vld [vmem:[%s2120_s0 + $0x80] sm:$0xff] }
   0xd   :  { %v70_v49 = vld [vmem:[%s2120_s0 + $0x1b8] sm:$0xff]  ;;  %v32_v51 = vld [vmem:[%s2120_s0 + $0x88] sm:$0xff]  ;;  %v71_v52 = vld [vmem:[%s2120_s0 + $0x1c0] sm:$0xff]  ;;  %v102_v54 = vpack.c.bf16 %v30_v47, %v29_v46 }
   0xe   :  { %v72_v53 = vld [vmem:[%s2120_s0 + $0x1c8] sm:$0xff]  ;;  %v122_v55 = vpack.c.bf16 %v70_v49, %v69_v48  ;;  %v103_v56 = vpack.c.bf16 %v32_v51, %v31_v50  ;;  %v33_v58 = vld [vmem:[%s2120_s0 + $0x90] sm:$0xff]  ;;  %v34_v59 = vld [vmem:[%s2120_s0 + $0x98] sm:$0xff] }
   0xf   :  { %1309 = vmatpush3.bf16.msra.mxu0 %v1401_v9  ;;  %1397 = vmatpush3.bf16.msra.mxu1 %v1401_v9  ;;  %v123_v57 = vpack.c.bf16 %v72_v53, %v71_v52  ;;  %v73_v60 = vld [vmem:[%s2120_s0 + $0x1d0] sm:$0xff]  ;;  %v74_v61 = vld [vmem:[%s2120_s0 + $0x1d8] sm:$0xff]  ;;  %v35_v62 = vld [vmem:[%s2120_s0 + $0xa0] sm:$0xff]  ;;  %v104_v2 = vpack.c.bf16 %v34_v59, %v33_v58 }
  0x10   :  { %v36_v63 = vld [vmem:[%s2120_s0 + $0xa8] sm:$0xff]  ;;  %v75_v0 = vld [vmem:[%s2120_s0 + $0x1e0] sm:$0xff]  ;;  %v124_v3 = vpack.c.bf16 %v74_v61, %v73_v60  ;;  %v37_v6 = vld [vmem:[%s2120_s0 + $0xb0] sm:$0xff] }
  0x11   :  { %v76_v1 = vld [vmem:[%s2120_s0 + $0x1e8] sm:$0xff]  ;;  %v105_v4 = vpack.c.bf16 %v36_v63, %v35_v62  ;;  %v38_v7 = vld [vmem:[%s2120_s0 + $0xb8] sm:$0xff]  ;;  %v77_v8 = vld [vmem:[%s2120_s0 + $0x1f0] sm:$0xff] }
  0x12   :  { %1311 = vmatmul.mubr.msk.bf16.vlgmr.msra.gmra.mxu0 %vm174_vm0, %v96_v18  ;;  %1351 = vmatmul.mubr.msk.bf16.vlgmr.msra.gmra.mxu1 %vm174_vm0, %v116_v19  ;;  %v125_v5 = vpack.c.bf16 %v76_v1, %v75_v0  ;;  %v78_v9 = vld [vmem:[%s2120_s0 + $0x1f8] sm:$0xff]  ;;  %v39_v10 = vld [vmem:[%s2120_s0 + $0xc0] sm:$0xff]  ;;  %v40_v11 = vld [vmem:[%s2120_s0 + $0xc8] sm:$0xff]  ;;  %v106_v14 = vpack.c.bf16 %v38_v7, %v37_v6 }
  0x13   :  { %1314 = vmatprep.mubr.msk.bf16.mxu0 %vm174_vm0, %v97_v20  ;;  %1354 = vmatprep.mubr.msk.bf16.mxu1 %vm174_vm0, %v117_v21  ;;  %v79_v12 = vld [vmem:[%s2120_s0 + $0x200] sm:$0xff]  ;;  %v80_v13 = vld [vmem:[%s2120_s0 + $0x208] sm:$0xff]  ;;  %v126_v15 = vpack.c.bf16 %v78_v9, %v77_v8  ;;  %v107_v16 = vpack.c.bf16 %v40_v11, %v39_v10  ;;  %v41_v18 = vld [vmem:[%s2120_s0 + $0xd0] sm:$0xff] }
  0x14   :  { %v127_v17 = vpack.c.bf16 %v80_v13, %v79_v12  ;;  %v42_v19 = vld [vmem:[%s2120_s0 + $0xd8] sm:$0xff]  ;;  %v81_v20 = vld [vmem:[%s2120_s0 + $0x210] sm:$0xff]  ;;  %v43_v22 = vld [vmem:[%s2120_s0 + $0xe0] sm:$0xff] }
  0x15   :  { %v82_v21 = vld [vmem:[%s2120_s0 + $0x218] sm:$0xff]  ;;  %v44_v23 = vld [vmem:[%s2120_s0 + $0xe8] sm:$0xff]  ;;  %v83_v24 = vld [vmem:[%s2120_s0 + $0x220] sm:$0xff]  ;;  %v108_v26 = vpack.c.bf16 %v42_v19, %v41_v18 }
  0x16   :  { %v84_v25 = vld [vmem:[%s2120_s0 + $0x228] sm:$0xff]  ;;  %v128_v27 = vpack.c.bf16 %v82_v21, %v81_v20  ;;  %v109_v28 = vpack.c.bf16 %v44_v23, %v43_v22  ;;  %v47_v34 = vld [vmem:[%s2120_s0 + $0x100] sm:$0xff] }
  0x17   :  { %v129_v29 = vpack.c.bf16 %v84_v25, %v83_v24  ;;  %v48_v35 = vld [vmem:[%s2120_s0 + $0x108] sm:$0xff]  ;;  %v87_v36 = vld [vmem:[%s2120_s0 + $0x240] sm:$0xff] }
  0x18   :  { %v88_v37 = vld [vmem:[%s2120_s0 + $0x248] sm:$0xff]  ;;  %v111_v40 = vpack.c.bf16 %v48_v35, %v47_v34  ;;  %v51_v46 = vld [vmem:[%s2120_s0 + $0x120] sm:$0xff] }
  0x19   :  { %v131_v41 = vpack.c.bf16 %v88_v37, %v87_v36  ;;  %v52_v47 = vld [vmem:[%s2120_s0 + $0x128] sm:$0xff]  ;;  %v91_v48 = vld [vmem:[%s2120_s0 + $0x260] sm:$0xff] }
  0x1a   :  { %1315 = vmatmul.mubr.msk.bf16.gmra.mxu0 %vm174_vm0, %v98_v30  ;;  %1355 = vmatmul.mubr.msk.bf16.gmra.mxu1 %vm174_vm0, %v118_v31  ;;  %v45_v30 = vld [vmem:[%s2120_s0 + $0xf0] sm:$0xff]  ;;  %v46_v31 = vld [vmem:[%s2120_s0 + $0xf8] sm:$0xff]  ;;  %v92_v49 = vld [vmem:[%s2120_s0 + $0x268] sm:$0xff]  ;;  %v113_v52 = vpack.c.bf16 %v52_v47, %v51_v46 }
  0x1b   :  { %1318 = vmatprep.mubr.msk.bf16.mxu0 %vm174_vm0, %v99_v32  ;;  %1358 = vmatprep.mubr.msk.bf16.mxu1 %vm174_vm0, %v119_v33  ;;  %v85_v32 = vld [vmem:[%s2120_s0 + $0x230] sm:$0xff]  ;;  %v86_v33 = vld [vmem:[%s2120_s0 + $0x238] sm:$0xff]  ;;  %v110_v38 = vpack.c.bf16 %v46_v31, %v45_v30  ;;  %v133_v53 = vpack.c.bf16 %v92_v49, %v91_v48  ;;  %v1717_v60 = vld [vmem:[%s2121_s2] ss:$0 sm:$0xff] }
  0x1c   :  { %v130_v39 = vpack.c.bf16 %v86_v33, %v85_v32 }
  0x22   :  { %1319 = vmatmul.mubr.msk.bf16.gmra.mxu0 %vm174_vm0, %v100_v42  ;;  %1359 = vmatmul.mubr.msk.bf16.gmra.mxu1 %vm174_vm0, %v120_v43  ;;  %v49_v42 = vld [vmem:[%s2120_s0 + $0x110] sm:$0xff]  ;;  %v50_v43 = vld [vmem:[%s2120_s0 + $0x118] sm:$0xff] }
  0x23   :  { %1322 = vmatprep.mubr.msk.bf16.mxu0 %vm174_vm0, %v101_v44  ;;  %1362 = vmatprep.mubr.msk.bf16.mxu1 %vm174_vm0, %v121_v45  ;;  %v89_v44 = vld [vmem:[%s2120_s0 + $0x250] sm:$0xff]  ;;  %v90_v45 = vld [vmem:[%s2120_s0 + $0x258] sm:$0xff]  ;;  %v112_v50 = vpack.c.bf16 %v50_v43, %v49_v42 }
  0x24   :  { %v132_v51 = vpack.c.bf16 %v90_v45, %v89_v44 }
  0x2a   :  { %1323 = vmatmul.mubr.msk.bf16.gmra.mxu0 %vm174_vm0, %v102_v54  ;;  %1363 = vmatmul.mubr.msk.bf16.gmra.mxu1 %vm174_vm0, %v122_v55  ;;  %v53_v54 = vld [vmem:[%s2120_s0 + $0x130] sm:$0xff]  ;;  %v54_v55 = vld [vmem:[%s2120_s0 + $0x138] sm:$0xff] }
  0x2b   :  { %1326 = vmatprep.mubr.msk.bf16.mxu0 %vm174_vm0, %v103_v56  ;;  %1366 = vmatprep.mubr.msk.bf16.mxu1 %vm174_vm0, %v123_v57  ;;  %v93_v56 = vld [vmem:[%s2120_s0 + $0x270] sm:$0xff]  ;;  %v94_v57 = vld [vmem:[%s2120_s0 + $0x278] sm:$0xff]  ;;  %v114_v58 = vpack.c.bf16 %v54_v55, %v53_v54 }
  0x2c   :  { %v134_v59 = vpack.c.bf16 %v94_v57, %v93_v56 }
  0x32   :  { %1327 = vmatmul.mubr.msk.bf16.gmra.mxu0 %vm174_vm0, %v104_v2  ;;  %1367 = vmatmul.mubr.msk.bf16.gmra.mxu1 %vm174_vm0, %v124_v3 }
  0x33   :  { %1330 = vmatprep.mubr.msk.bf16.mxu0 %vm174_vm0, %v105_v4  ;;  %1370 = vmatprep.mubr.msk.bf16.mxu1 %vm174_vm0, %v125_v5 }
  0x3a   :  { %1331 = vmatmul.mubr.msk.bf16.gmra.mxu0 %vm174_vm0, %v106_v14  ;;  %1371 = vmatmul.mubr.msk.bf16.gmra.mxu1 %vm174_vm0, %v126_v15 }
  0x3b   :  { %1334 = vmatprep.mubr.msk.bf16.mxu0 %vm174_vm0, %v107_v16  ;;  %1374 = vmatprep.mubr.msk.bf16.mxu1 %vm174_vm0, %v127_v17 }
  0x42   :  { %1335 = vmatmul.mubr.msk.bf16.gmra.mxu0 %vm174_vm0, %v108_v26  ;;  %1375 = vmatmul.mubr.msk.bf16.gmra.mxu1 %vm174_vm0, %v128_v27 }
  0x43   :  { %1338 = vmatprep.mubr.msk.bf16.mxu0 %vm174_vm0, %v109_v28  ;;  %1378 = vmatprep.mubr.msk.bf16.mxu1 %vm174_vm0, %v129_v29 }
  0x4a   :  { %1339 = vmatmul.mubr.msk.bf16.gmra.mxu0 %vm174_vm0, %v110_v38  ;;  %1379 = vmatmul.mubr.msk.bf16.gmra.mxu1 %vm174_vm0, %v130_v39 }
  0x4b   :  { %1342 = vmatprep.mubr.msk.bf16.mxu0 %vm174_vm0, %v111_v40  ;;  %1382 = vmatprep.mubr.msk.bf16.mxu1 %vm174_vm0, %v131_v41 }
  0x52   :  { %1343 = vmatmul.mubr.msk.bf16.gmra.mxu0 %vm174_vm0, %v112_v50  ;;  %1383 = vmatmul.mubr.msk.bf16.gmra.mxu1 %vm174_vm0, %v132_v51 }
  0x53   :  { %1346 = vmatprep.mubr.msk.bf16.mxu0 %vm174_vm0, %v113_v52  ;;  %1386 = vmatprep.mubr.msk.bf16.mxu1 %vm174_vm0, %v133_v53 }
  0x5a   :  { %1347 = vmatmul.mubr.msk.bf16.gmra.mxu0 %vm174_vm0, %v114_v58  ;;  %1387 = vmatmul.mubr.msk.bf16.gmra.mxu1 %vm174_vm0, %v134_v59 }
  0xd2   :  { %v1312_v61 = vpop.f32.mrf.mxu0  ;;  %v1352_v62 = vpop.f32.mrf.mxu1 }
  0xd3   :  { %v338_v63 = vadd.f32 %v1312_v61, %v1717_v60  ;;  %v498_v0 = vadd.f32 %v1352_v62, %v1717_v60 }
  0xd4   :  { %v329_v1 = vpop.f32.mrf.mxu0  ;;  %v489_v2 = vpop.f32.mrf.mxu1 }
  0xd5   :  { %v1180_v3 = vpack.c.bf16 %v338_v63, %v338_v63  ;;  %v1220_v4 = vpack.c.bf16 %v498_v0, %v498_v0  ;;  %v330_v5 = vadd.f32 %v1717_v60, %v329_v1  ;;  %v490_v6 = vadd.f32 %v1717_v60, %v489_v2 }
  0xd6   :  { %v1313_v7 = vpop.f32.mrf.mxu0  ;;  %v1353_v8 = vpop.f32.mrf.mxu1 }
  0xd7   :  { %971 = vst.msk [vmem:[%s2122_s3 + $0x8] sm:$0xf] %vm968_vm1, %v1180_v3  ;;  %1011 = vst.msk [vmem:[%s2122_s3 + $0xa8] sm:$0xf] %vm968_vm1, %v1220_v4  ;;  %v1178_v9 = vpack.c.bf16 %v330_v5, %v330_v5  ;;  %v1218_v10 = vpack.c.bf16 %v490_v6, %v490_v6  ;;  %v341_v11 = vadd.f32 %v1313_v7, %v1717_v60 }
  0xd8   :  { %v501_v12 = vadd.f32 %v1353_v8, %v1717_v60  ;;  %v332_v13 = vpop.f32.mrf.mxu0  ;;  %v492_v14 = vpop.f32.mrf.mxu1 }
  0xd9   :  { %969 = vst.msk [vmem:[%s2122_s3] sm:$0xf] %vm968_vm1, %v1178_v9  ;;  %1009 = vst.msk [vmem:[%s2122_s3 + $0xa0] sm:$0xf] %vm968_vm1, %v1218_v10  ;;  %v1181_v15 = vpack.c.bf16 %v341_v11, %v341_v11  ;;  %v333_v17 = vadd.f32 %v1717_v60, %v332_v13  ;;  %v493_v18 = vadd.f32 %v1717_v60, %v492_v14 }
  0xda   :  { %v1221_v16 = vpack.c.bf16 %v501_v12, %v501_v12  ;;  %v1316_v19 = vpop.f32.mrf.mxu0  ;;  %v1356_v20 = vpop.f32.mrf.mxu1 }
  0xdb   :  { %972 = vst.msk [vmem:[%s2122_s3 + $0xc] sm:$0xf] %vm968_vm1, %v1181_v15  ;;  %v1179_v21 = vpack.c.bf16 %v333_v17, %v333_v17  ;;  %v1219_v22 = vpack.c.bf16 %v493_v18, %v493_v18  ;;  %v354_v23 = vadd.f32 %v1316_v19, %v1717_v60  ;;  %v514_v24 = vadd.f32 %v1356_v20, %v1717_v60 }
  0xdc   :  { %1012 = vst.msk [vmem:[%s2122_s3 + $0xac] sm:$0xf] %vm968_vm1, %v1221_v16  ;;  %v345_v25 = vpop.f32.mrf.mxu0  ;;  %v505_v26 = vpop.f32.mrf.mxu1 }
  0xdd   :  { %970 = vst.msk [vmem:[%s2122_s3 + $0x4] sm:$0xf] %vm968_vm1, %v1179_v21  ;;  %1010 = vst.msk [vmem:[%s2122_s3 + $0xa4] sm:$0xf] %vm968_vm1, %v1219_v22  ;;  %v1184_v27 = vpack.c.bf16 %v354_v23, %v354_v23  ;;  %v1224_v28 = vpack.c.bf16 %v514_v24, %v514_v24  ;;  %v346_v29 = vadd.f32 %v1717_v60, %v345_v25 }
  0xde   :  { %v506_v30 = vadd.f32 %v1717_v60, %v505_v26  ;;  %v1317_v31 = vpop.f32.mrf.mxu0  ;;  %v1357_v32 = vpop.f32.mrf.mxu1 }
  0xdf   :  { %975 = vst.msk [vmem:[%s2122_s3 + $0x18] sm:$0xf] %vm968_vm1, %v1184_v27  ;;  %1015 = vst.msk [vmem:[%s2122_s3 + $0xb8] sm:$0xf] %vm968_vm1, %v1224_v28  ;;  %v1182_v33 = vpack.c.bf16 %v346_v29, %v346_v29  ;;  %v357_v35 = vadd.f32 %v1317_v31, %v1717_v60  ;;  %v517_v36 = vadd.f32 %v1357_v32, %v1717_v60 }
  0xe0   :  { %v1222_v34 = vpack.c.bf16 %v506_v30, %v506_v30  ;;  %v348_v37 = vpop.f32.mrf.mxu0  ;;  %v508_v38 = vpop.f32.mrf.mxu1 }
  0xe1   :  { %973 = vst.msk [vmem:[%s2122_s3 + $0x10] sm:$0xf] %vm968_vm1, %v1182_v33  ;;  %v1185_v39 = vpack.c.bf16 %v357_v35, %v357_v35  ;;  %v1225_v40 = vpack.c.bf16 %v517_v36, %v517_v36  ;;  %v349_v41 = vadd.f32 %v1717_v60, %v348_v37  ;;  %v509_v42 = vadd.f32 %v1717_v60, %v508_v38 }
  0xe2   :  { %1013 = vst.msk [vmem:[%s2122_s3 + $0xb0] sm:$0xf] %vm968_vm1, %v1222_v34  ;;  %v1320_v43 = vpop.f32.mrf.mxu0  ;;  %v1360_v44 = vpop.f32.mrf.mxu1 }
  0xe3   :  { %976 = vst.msk [vmem:[%s2122_s3 + $0x1c] sm:$0xf] %vm968_vm1, %v1185_v39  ;;  %1016 = vst.msk [vmem:[%s2122_s3 + $0xbc] sm:$0xf] %vm968_vm1, %v1225_v40  ;;  %v1183_v45 = vpack.c.bf16 %v349_v41, %v349_v41  ;;  %v1223_v46 = vpack.c.bf16 %v509_v42, %v509_v42  ;;  %v370_v47 = vadd.f32 %v1320_v43, %v1717_v60 }
  0xe4   :  { %v530_v48 = vadd.f32 %v1360_v44, %v1717_v60  ;;  %v361_v49 = vpop.f32.mrf.mxu0  ;;  %v521_v50 = vpop.f32.mrf.mxu1 }
  0xe5   :  { %974 = vst.msk [vmem:[%s2122_s3 + $0x14] sm:$0xf] %vm968_vm1, %v1183_v45  ;;  %1014 = vst.msk [vmem:[%s2122_s3 + $0xb4] sm:$0xf] %vm968_vm1, %v1223_v46  ;;  %v1188_v51 = vpack.c.bf16 %v370_v47, %v370_v47  ;;  %v362_v53 = vadd.f32 %v1717_v60, %v361_v49  ;;  %v522_v54 = vadd.f32 %v1717_v60, %v521_v50 }
  0xe6   :  { %v1228_v52 = vpack.c.bf16 %v530_v48, %v530_v48  ;;  %v1321_v55 = vpop.f32.mrf.mxu0  ;;  %v1361_v56 = vpop.f32.mrf.mxu1 }
  0xe7   :  { %979 = vst.msk [vmem:[%s2122_s3 + $0x28] sm:$0xf] %vm968_vm1, %v1188_v51  ;;  %v1186_v57 = vpack.c.bf16 %v362_v53, %v362_v53  ;;  %v1226_v58 = vpack.c.bf16 %v522_v54, %v522_v54  ;;  %v373_v59 = vadd.f32 %v1321_v55, %v1717_v60  ;;  %v533_v61 = vadd.f32 %v1361_v56, %v1717_v60 }
  0xe8   :  { %1019 = vst.msk [vmem:[%s2122_s3 + $0xc8] sm:$0xf] %vm968_vm1, %v1228_v52  ;;  %v364_v62 = vpop.f32.mrf.mxu0  ;;  %v524_v63 = vpop.f32.mrf.mxu1 }
  0xe9   :  { %977 = vst.msk [vmem:[%s2122_s3 + $0x20] sm:$0xf] %vm968_vm1, %v1186_v57  ;;  %1017 = vst.msk [vmem:[%s2122_s3 + $0xc0] sm:$0xf] %vm968_vm1, %v1226_v58  ;;  %v1189_v0 = vpack.c.bf16 %v373_v59, %v373_v59  ;;  %v1229_v1 = vpack.c.bf16 %v533_v61, %v533_v61  ;;  %v365_v2 = vadd.f32 %v1717_v60, %v364_v62 }
  0xea   :  { %v525_v3 = vadd.f32 %v1717_v60, %v524_v63  ;;  %v1324_v4 = vpop.f32.mrf.mxu0  ;;  %v1364_v5 = vpop.f32.mrf.mxu1 }
  0xeb   :  { %980 = vst.msk [vmem:[%s2122_s3 + $0x2c] sm:$0xf] %vm968_vm1, %v1189_v0  ;;  %1020 = vst.msk [vmem:[%s2122_s3 + $0xcc] sm:$0xf] %vm968_vm1, %v1229_v1  ;;  %v1187_v6 = vpack.c.bf16 %v365_v2, %v365_v2  ;;  %v386_v8 = vadd.f32 %v1324_v4, %v1717_v60  ;;  %v546_v9 = vadd.f32 %v1364_v5, %v1717_v60 }
  0xec   :  { %v1227_v7 = vpack.c.bf16 %v525_v3, %v525_v3  ;;  %v377_v10 = vpop.f32.mrf.mxu0  ;;  %v537_v11 = vpop.f32.mrf.mxu1 }
  0xed   :  { %978 = vst.msk [vmem:[%s2122_s3 + $0x24] sm:$0xf] %vm968_vm1, %v1187_v6  ;;  %v1192_v12 = vpack.c.bf16 %v386_v8, %v386_v8  ;;  %v1232_v13 = vpack.c.bf16 %v546_v9, %v546_v9  ;;  %v378_v14 = vadd.f32 %v1717_v60, %v377_v10  ;;  %v538_v15 = vadd.f32 %v1717_v60, %v537_v11 }
  0xee   :  { %1018 = vst.msk [vmem:[%s2122_s3 + $0xc4] sm:$0xf] %vm968_vm1, %v1227_v7  ;;  %v1325_v16 = vpop.f32.mrf.mxu0  ;;  %v1365_v17 = vpop.f32.mrf.mxu1 }
  0xef   :  { %983 = vst.msk [vmem:[%s2122_s3 + $0x38] sm:$0xf] %vm968_vm1, %v1192_v12  ;;  %1023 = vst.msk [vmem:[%s2122_s3 + $0xd8] sm:$0xf] %vm968_vm1, %v1232_v13  ;;  %v1190_v18 = vpack.c.bf16 %v378_v14, %v378_v14  ;;  %v1230_v19 = vpack.c.bf16 %v538_v15, %v538_v15  ;;  %v389_v20 = vadd.f32 %v1325_v16, %v1717_v60 }
  0xf0   :  { %v549_v21 = vadd.f32 %v1365_v17, %v1717_v60  ;;  %v380_v22 = vpop.f32.mrf.mxu0  ;;  %v540_v23 = vpop.f32.mrf.mxu1 }
  0xf1   :  { %981 = vst.msk [vmem:[%s2122_s3 + $0x30] sm:$0xf] %vm968_vm1, %v1190_v18  ;;  %1021 = vst.msk [vmem:[%s2122_s3 + $0xd0] sm:$0xf] %vm968_vm1, %v1230_v19  ;;  %v1193_v24 = vpack.c.bf16 %v389_v20, %v389_v20  ;;  %v381_v26 = vadd.f32 %v1717_v60, %v380_v22  ;;  %v541_v27 = vadd.f32 %v1717_v60, %v540_v23 }
  0xf2   :  { %v1233_v25 = vpack.c.bf16 %v549_v21, %v549_v21  ;;  %v1328_v28 = vpop.f32.mrf.mxu0  ;;  %v1368_v29 = vpop.f32.mrf.mxu1 }
  0xf3   :  { %984 = vst.msk [vmem:[%s2122_s3 + $0x3c] sm:$0xf] %vm968_vm1, %v1193_v24  ;;  %v1191_v30 = vpack.c.bf16 %v381_v26, %v381_v26  ;;  %v1231_v31 = vpack.c.bf16 %v541_v27, %v541_v27  ;;  %v402_v32 = vadd.f32 %v1328_v28, %v1717_v60  ;;  %v562_v33 = vadd.f32 %v1368_v29, %v1717_v60 }
  0xf4   :  { %1024 = vst.msk [vmem:[%s2122_s3 + $0xdc] sm:$0xf] %vm968_vm1, %v1233_v25  ;;  %v393_v34 = vpop.f32.mrf.mxu0  ;;  %v553_v35 = vpop.f32.mrf.mxu1 }
  0xf5   :  { %982 = vst.msk [vmem:[%s2122_s3 + $0x34] sm:$0xf] %vm968_vm1, %v1191_v30  ;;  %1022 = vst.msk [vmem:[%s2122_s3 + $0xd4] sm:$0xf] %vm968_vm1, %v1231_v31  ;;  %v1196_v36 = vpack.c.bf16 %v402_v32, %v402_v32  ;;  %v1236_v37 = vpack.c.bf16 %v562_v33, %v562_v33  ;;  %v394_v38 = vadd.f32 %v1717_v60, %v393_v34 }
  0xf6   :  { %v554_v39 = vadd.f32 %v1717_v60, %v553_v35  ;;  %v1329_v40 = vpop.f32.mrf.mxu0  ;;  %v1369_v41 = vpop.f32.mrf.mxu1 }
  0xf7   :  { %987 = vst.msk [vmem:[%s2122_s3 + $0x48] sm:$0xf] %vm968_vm1, %v1196_v36  ;;  %1027 = vst.msk [vmem:[%s2122_s3 + $0xe8] sm:$0xf] %vm968_vm1, %v1236_v37  ;;  %v1194_v42 = vpack.c.bf16 %v394_v38, %v394_v38  ;;  %v405_v44 = vadd.f32 %v1329_v40, %v1717_v60  ;;  %v565_v45 = vadd.f32 %v1369_v41, %v1717_v60 }
  0xf8   :  { %v1234_v43 = vpack.c.bf16 %v554_v39, %v554_v39  ;;  %v396_v46 = vpop.f32.mrf.mxu0  ;;  %v556_v47 = vpop.f32.mrf.mxu1 }
  0xf9   :  { %985 = vst.msk [vmem:[%s2122_s3 + $0x40] sm:$0xf] %vm968_vm1, %v1194_v42  ;;  %v1197_v48 = vpack.c.bf16 %v405_v44, %v405_v44  ;;  %v1237_v49 = vpack.c.bf16 %v565_v45, %v565_v45  ;;  %v397_v50 = vadd.f32 %v1717_v60, %v396_v46  ;;  %v557_v51 = vadd.f32 %v1717_v60, %v556_v47 }
  0xfa   :  { %1025 = vst.msk [vmem:[%s2122_s3 + $0xe0] sm:$0xf] %vm968_vm1, %v1234_v43  ;;  %v1332_v52 = vpop.f32.mrf.mxu0  ;;  %v1372_v53 = vpop.f32.mrf.mxu1 }
  0xfb   :  { %988 = vst.msk [vmem:[%s2122_s3 + $0x4c] sm:$0xf] %vm968_vm1, %v1197_v48  ;;  %1028 = vst.msk [vmem:[%s2122_s3 + $0xec] sm:$0xf] %vm968_vm1, %v1237_v49  ;;  %v1195_v54 = vpack.c.bf16 %v397_v50, %v397_v50  ;;  %v1235_v55 = vpack.c.bf16 %v557_v51, %v557_v51  ;;  %v418_v56 = vadd.f32 %v1332_v52, %v1717_v60 }
  0xfc   :  { %v578_v57 = vadd.f32 %v1372_v53, %v1717_v60  ;;  %v409_v58 = vpop.f32.mrf.mxu0  ;;  %v569_v59 = vpop.f32.mrf.mxu1 }
  0xfd   :  { %986 = vst.msk [vmem:[%s2122_s3 + $0x44] sm:$0xf] %vm968_vm1, %v1195_v54  ;;  %1026 = vst.msk [vmem:[%s2122_s3 + $0xe4] sm:$0xf] %vm968_vm1, %v1235_v55  ;;  %v1200_v61 = vpack.c.bf16 %v418_v56, %v418_v56  ;;  %v410_v63 = vadd.f32 %v1717_v60, %v409_v58  ;;  %v570_v0 = vadd.f32 %v1717_v60, %v569_v59 }
  0xfe   :  { %v1240_v62 = vpack.c.bf16 %v578_v57, %v578_v57  ;;  %v1333_v1 = vpop.f32.mrf.mxu0  ;;  %v1373_v2 = vpop.f32.mrf.mxu1 }
  0xff   :  { %991 = vst.msk [vmem:[%s2122_s3 + $0x58] sm:$0xf] %vm968_vm1, %v1200_v61  ;;  %v1198_v3 = vpack.c.bf16 %v410_v63, %v410_v63  ;;  %v1238_v4 = vpack.c.bf16 %v570_v0, %v570_v0  ;;  %v421_v5 = vadd.f32 %v1333_v1, %v1717_v60  ;;  %v581_v6 = vadd.f32 %v1373_v2, %v1717_v60 }
 0x100   :  { %1031 = vst.msk [vmem:[%s2122_s3 + $0xf8] sm:$0xf] %vm968_vm1, %v1240_v62  ;;  %v412_v7 = vpop.f32.mrf.mxu0  ;;  %v572_v8 = vpop.f32.mrf.mxu1 }
 0x101   :  { %989 = vst.msk [vmem:[%s2122_s3 + $0x50] sm:$0xf] %vm968_vm1, %v1198_v3  ;;  %1029 = vst.msk [vmem:[%s2122_s3 + $0xf0] sm:$0xf] %vm968_vm1, %v1238_v4  ;;  %v1201_v9 = vpack.c.bf16 %v421_v5, %v421_v5  ;;  %v1241_v10 = vpack.c.bf16 %v581_v6, %v581_v6  ;;  %v413_v11 = vadd.f32 %v1717_v60, %v412_v7 }
 0x102   :  { %v573_v12 = vadd.f32 %v1717_v60, %v572_v8  ;;  %v1336_v13 = vpop.f32.mrf.mxu0  ;;  %v1376_v14 = vpop.f32.mrf.mxu1 }
 0x103   :  { %992 = vst.msk [vmem:[%s2122_s3 + $0x5c] sm:$0xf] %vm968_vm1, %v1201_v9  ;;  %1032 = vst.msk [vmem:[%s2122_s3 + $0xfc] sm:$0xf] %vm968_vm1, %v1241_v10  ;;  %v1199_v15 = vpack.c.bf16 %v413_v11, %v413_v11  ;;  %v434_v17 = vadd.f32 %v1336_v13, %v1717_v60  ;;  %v594_v18 = vadd.f32 %v1376_v14, %v1717_v60 }
 0x104   :  { %v1239_v16 = vpack.c.bf16 %v573_v12, %v573_v12  ;;  %v425_v19 = vpop.f32.mrf.mxu0  ;;  %v585_v20 = vpop.f32.mrf.mxu1 }
 0x105   :  { %990 = vst.msk [vmem:[%s2122_s3 + $0x54] sm:$0xf] %vm968_vm1, %v1199_v15  ;;  %v1204_v21 = vpack.c.bf16 %v434_v17, %v434_v17  ;;  %v1244_v22 = vpack.c.bf16 %v594_v18, %v594_v18  ;;  %v426_v23 = vadd.f32 %v1717_v60, %v425_v19  ;;  %v586_v24 = vadd.f32 %v1717_v60, %v585_v20 }
 0x106   :  { %1030 = vst.msk [vmem:[%s2122_s3 + $0xf4] sm:$0xf] %vm968_vm1, %v1239_v16  ;;  %v1337_v25 = vpop.f32.mrf.mxu0  ;;  %v1377_v26 = vpop.f32.mrf.mxu1 }
 0x107   :  { %995 = vst.msk [vmem:[%s2122_s3 + $0x68] sm:$0xf] %vm968_vm1, %v1204_v21  ;;  %1035 = vst.msk [vmem:[%s2122_s3 + $0x108] sm:$0xf] %vm968_vm1, %v1244_v22  ;;  %v1202_v27 = vpack.c.bf16 %v426_v23, %v426_v23  ;;  %v1242_v28 = vpack.c.bf16 %v586_v24, %v586_v24  ;;  %v437_v29 = vadd.f32 %v1337_v25, %v1717_v60 }
 0x108   :  { %v597_v30 = vadd.f32 %v1377_v26, %v1717_v60  ;;  %v428_v31 = vpop.f32.mrf.mxu0  ;;  %v588_v32 = vpop.f32.mrf.mxu1 }
 0x109   :  { %993 = vst.msk [vmem:[%s2122_s3 + $0x60] sm:$0xf] %vm968_vm1, %v1202_v27  ;;  %1033 = vst.msk [vmem:[%s2122_s3 + $0x100] sm:$0xf] %vm968_vm1, %v1242_v28  ;;  %v1205_v33 = vpack.c.bf16 %v437_v29, %v437_v29  ;;  %v429_v35 = vadd.f32 %v1717_v60, %v428_v31  ;;  %v589_v36 = vadd.f32 %v1717_v60, %v588_v32 }
 0x10a   :  { %v1245_v34 = vpack.c.bf16 %v597_v30, %v597_v30  ;;  %v1340_v37 = vpop.f32.mrf.mxu0  ;;  %v1380_v38 = vpop.f32.mrf.mxu1 }
 0x10b   :  { %996 = vst.msk [vmem:[%s2122_s3 + $0x6c] sm:$0xf] %vm968_vm1, %v1205_v33  ;;  %v1203_v39 = vpack.c.bf16 %v429_v35, %v429_v35  ;;  %v1243_v40 = vpack.c.bf16 %v589_v36, %v589_v36  ;;  %v450_v41 = vadd.f32 %v1340_v37, %v1717_v60  ;;  %v610_v42 = vadd.f32 %v1380_v38, %v1717_v60 }
 0x10c   :  { %1036 = vst.msk [vmem:[%s2122_s3 + $0x10c] sm:$0xf] %vm968_vm1, %v1245_v34  ;;  %v441_v43 = vpop.f32.mrf.mxu0  ;;  %v601_v44 = vpop.f32.mrf.mxu1 }
 0x10d   :  { %994 = vst.msk [vmem:[%s2122_s3 + $0x64] sm:$0xf] %vm968_vm1, %v1203_v39  ;;  %1034 = vst.msk [vmem:[%s2122_s3 + $0x104] sm:$0xf] %vm968_vm1, %v1243_v40  ;;  %v1208_v45 = vpack.c.bf16 %v450_v41, %v450_v41  ;;  %v1248_v46 = vpack.c.bf16 %v610_v42, %v610_v42  ;;  %v442_v47 = vadd.f32 %v1717_v60, %v441_v43 }
 0x10e   :  { %v602_v48 = vadd.f32 %v1717_v60, %v601_v44  ;;  %v1341_v49 = vpop.f32.mrf.mxu0  ;;  %v1381_v50 = vpop.f32.mrf.mxu1 }
 0x10f   :  { %999 = vst.msk [vmem:[%s2122_s3 + $0x78] sm:$0xf] %vm968_vm1, %v1208_v45  ;;  %1039 = vst.msk [vmem:[%s2122_s3 + $0x118] sm:$0xf] %vm968_vm1, %v1248_v46  ;;  %v1206_v51 = vpack.c.bf16 %v442_v47, %v442_v47  ;;  %v453_v53 = vadd.f32 %v1341_v49, %v1717_v60  ;;  %v613_v54 = vadd.f32 %v1381_v50, %v1717_v60 }
 0x110   :  { %v1246_v52 = vpack.c.bf16 %v602_v48, %v602_v48  ;;  %v444_v55 = vpop.f32.mrf.mxu0  ;;  %v604_v56 = vpop.f32.mrf.mxu1 }
 0x111   :  { %997 = vst.msk [vmem:[%s2122_s3 + $0x70] sm:$0xf] %vm968_vm1, %v1206_v51  ;;  %v1209_v57 = vpack.c.bf16 %v453_v53, %v453_v53  ;;  %v1249_v58 = vpack.c.bf16 %v613_v54, %v613_v54  ;;  %v445_v59 = vadd.f32 %v1717_v60, %v444_v55  ;;  %v605_v61 = vadd.f32 %v1717_v60, %v604_v56 }
 0x112   :  { %1037 = vst.msk [vmem:[%s2122_s3 + $0x110] sm:$0xf] %vm968_vm1, %v1246_v52  ;;  %v1344_v62 = vpop.f32.mrf.mxu0  ;;  %v1384_v63 = vpop.f32.mrf.mxu1 }
 0x113   :  { %1000 = vst.msk [vmem:[%s2122_s3 + $0x7c] sm:$0xf] %vm968_vm1, %v1209_v57  ;;  %1040 = vst.msk [vmem:[%s2122_s3 + $0x11c] sm:$0xf] %vm968_vm1, %v1249_v58  ;;  %v1207_v0 = vpack.c.bf16 %v445_v59, %v445_v59  ;;  %v1247_v1 = vpack.c.bf16 %v605_v61, %v605_v61  ;;  %v466_v2 = vadd.f32 %v1344_v62, %v1717_v60 }
 0x114   :  { %v626_v3 = vadd.f32 %v1384_v63, %v1717_v60  ;;  %v457_v4 = vpop.f32.mrf.mxu0  ;;  %v617_v5 = vpop.f32.mrf.mxu1 }
 0x115   :  { %998 = vst.msk [vmem:[%s2122_s3 + $0x74] sm:$0xf] %vm968_vm1, %v1207_v0  ;;  %1038 = vst.msk [vmem:[%s2122_s3 + $0x114] sm:$0xf] %vm968_vm1, %v1247_v1  ;;  %v1212_v6 = vpack.c.bf16 %v466_v2, %v466_v2  ;;  %v458_v8 = vadd.f32 %v1717_v60, %v457_v4  ;;  %v618_v9 = vadd.f32 %v1717_v60, %v617_v5 }
 0x116   :  { %v1252_v7 = vpack.c.bf16 %v626_v3, %v626_v3  ;;  %v1345_v10 = vpop.f32.mrf.mxu0  ;;  %v1385_v11 = vpop.f32.mrf.mxu1 }
 0x117   :  { %1003 = vst.msk [vmem:[%s2122_s3 + $0x88] sm:$0xf] %vm968_vm1, %v1212_v6  ;;  %v1210_v12 = vpack.c.bf16 %v458_v8, %v458_v8  ;;  %v1250_v13 = vpack.c.bf16 %v618_v9, %v618_v9  ;;  %v469_v14 = vadd.f32 %v1345_v10, %v1717_v60  ;;  %v629_v15 = vadd.f32 %v1385_v11, %v1717_v60 }
 0x118   :  { %1043 = vst.msk [vmem:[%s2122_s3 + $0x128] sm:$0xf] %vm968_vm1, %v1252_v7  ;;  %v460_v16 = vpop.f32.mrf.mxu0  ;;  %v620_v17 = vpop.f32.mrf.mxu1 }
 0x119   :  { %1001 = vst.msk [vmem:[%s2122_s3 + $0x80] sm:$0xf] %vm968_vm1, %v1210_v12  ;;  %1041 = vst.msk [vmem:[%s2122_s3 + $0x120] sm:$0xf] %vm968_vm1, %v1250_v13  ;;  %v1213_v18 = vpack.c.bf16 %v469_v14, %v469_v14  ;;  %v1253_v19 = vpack.c.bf16 %v629_v15, %v629_v15  ;;  %v461_v20 = vadd.f32 %v1717_v60, %v460_v16 }
 0x11a   :  { %v621_v21 = vadd.f32 %v1717_v60, %v620_v17  ;;  %v1348_v22 = vpop.f32.mrf.mxu0  ;;  %v1388_v23 = vpop.f32.mrf.mxu1 }
 0x11b   :  { %1004 = vst.msk [vmem:[%s2122_s3 + $0x8c] sm:$0xf] %vm968_vm1, %v1213_v18  ;;  %1044 = vst.msk [vmem:[%s2122_s3 + $0x12c] sm:$0xf] %vm968_vm1, %v1253_v19  ;;  %v1211_v24 = vpack.c.bf16 %v461_v20, %v461_v20  ;;  %v482_v26 = vadd.f32 %v1348_v22, %v1717_v60  ;;  %v642_v27 = vadd.f32 %v1388_v23, %v1717_v60 }
 0x11c   :  { %v1251_v25 = vpack.c.bf16 %v621_v21, %v621_v21  ;;  %v473_v28 = vpop.f32.mrf.mxu0  ;;  %v633_v29 = vpop.f32.mrf.mxu1 }
 0x11d   :  { %1002 = vst.msk [vmem:[%s2122_s3 + $0x84] sm:$0xf] %vm968_vm1, %v1211_v24  ;;  %v1216_v30 = vpack.c.bf16 %v482_v26, %v482_v26  ;;  %v1256_v31 = vpack.c.bf16 %v642_v27, %v642_v27  ;;  %v474_v32 = vadd.f32 %v1717_v60, %v473_v28  ;;  %v634_v33 = vadd.f32 %v1717_v60, %v633_v29 }
 0x11e   :  { %1042 = vst.msk [vmem:[%s2122_s3 + $0x124] sm:$0xf] %vm968_vm1, %v1251_v25  ;;  %v1349_v34 = vpop.f32.mrf.mxu0  ;;  %v1389_v35 = vpop.f32.mrf.mxu1 }
 0x11f   :  { %1007 = vst.msk [vmem:[%s2122_s3 + $0x98] sm:$0xf] %vm968_vm1, %v1216_v30  ;;  %1047 = vst.msk [vmem:[%s2122_s3 + $0x138] sm:$0xf] %vm968_vm1, %v1256_v31  ;;  %v1214_v36 = vpack.c.bf16 %v474_v32, %v474_v32  ;;  %v1254_v37 = vpack.c.bf16 %v634_v33, %v634_v33  ;;  %v485_v38 = vadd.f32 %v1349_v34, %v1717_v60 }
 0x120   :  { %v645_v39 = vadd.f32 %v1389_v35, %v1717_v60  ;;  %v476_v40 = vpop.f32.mrf.mxu0  ;;  %v636_v41 = vpop.f32.mrf.mxu1 }
 0x121   :  { %1005 = vst.msk [vmem:[%s2122_s3 + $0x90] sm:$0xf] %vm968_vm1, %v1214_v36  ;;  %1045 = vst.msk [vmem:[%s2122_s3 + $0x130] sm:$0xf] %vm968_vm1, %v1254_v37  ;;  %v1217_v42 = vpack.c.bf16 %v485_v38, %v485_v38  ;;  %v477_v44 = vadd.f32 %v1717_v60, %v476_v40  ;;  %v637_v45 = vadd.f32 %v1717_v60, %v636_v41 }
 0x122   :  { %v1257_v43 = vpack.c.bf16 %v645_v39, %v645_v39 }
 0x123   :  { %1008 = vst.msk [vmem:[%s2122_s3 + $0x9c] sm:$0xf] %vm968_vm1, %v1217_v42  ;;  %v1215_v46 = vpack.c.bf16 %v477_v44, %v477_v44  ;;  %v1255_v47 = vpack.c.bf16 %v637_v45, %v637_v45 }
 0x124   :  { %1048 = vst.msk [vmem:[%s2122_s3 + $0x13c] sm:$0xf] %vm968_vm1, %v1257_v43 }
 0x125   :  { %1006 = vst.msk [vmem:[%s2122_s3 + $0x94] sm:$0xf] %vm968_vm1, %v1215_v46  ;;  %1046 = vst.msk [vmem:[%s2122_s3 + $0x134] sm:$0xf] %vm968_vm1, %v1255_v47 }

// kernel: deformable_decoder_layer_forward.7
= control target key start
LH: loop header
LB: loop body
LE: loop exit
PB: predicated region body
PF: predicated region fallthrough
CT: control target
= control target key end

     0   :  { %v543_v0 = vmov 0.0   ;;  %vm544_vm0 = vmmov 0   ;;  %vm86_vm1 = vcmask 523264   ;;  %s731_s2 = inlined_call_operand.vmem [shape: bf16[64,64], index: 2, kind: input, shape index: {}]   ;;  %s732_s1 = inlined_call_operand.vmem [shape: f32[16,64], index: 1, kind: input, shape index: {}]   ;;  %s733_s3 = inlined_call_operand.vmem [shape: f32[1,64], index: 3, kind: input, shape index: {}]   ;;  %s734_s0 = inlined_call_operand.vmem [shape: f32[16,64], index: 0, kind: input, shape index: {}]   ;;  %s735_s6 = inlined_call_operand.vmem [shape: bf16[64,128], index: 6, kind: input, shape index: {}]   ;;  %s736_s8 = inlined_call_operand.vmem [shape: bf16[128,64], index: 8, kind: input, shape index: {}]   ;;  %s737_s4 = inlined_call_operand.vmem [shape: f32[1,64], index: 4, kind: input, shape index: {}]   ;;  %s738_s5 = inlined_call_operand.vmem [shape: f32[1,64], index: 5, kind: input, shape index: {}]   ;;  %s739_s7 = inlined_call_operand.vmem [shape: f32[1,128], index: 7, kind: input, shape index: {}]   ;;  %s740_s9 = inlined_call_operand.vmem [shape: f32[1,64], index: 9, kind: input, shape index: {}]   ;;  %s741_s10 = inlined_call_operand.vmem [shape: f32[1,64], index: 10, kind: input, shape index: {}]   ;;  %s742_s11 = inlined_call_operand.vmem [shape: f32[1,64], index: 11, kind: input, shape index: {}]   ;;  %s743_s12 = inlined_call_operand.vmem [shape: f32[16,64], index: 12, kind: output, shape index: {}]  }
   0x1   :  { %473 = vmatprep.subr.bf16.mxu1 %v543_v0  ;;  %v519_v1 = vld [vmem:[%s731_s2 + $0x18] sm:$0xff]   ;;  %481 = vmatprep.mubr.msk.bf16.mxu1 %vm544_vm0, %v543_v0  ;;  %v520_v2 = vld [vmem:[%s731_s2 + $0x10] sm:$0xff]   ;;  %v521_v3 = vld [vmem:[%s731_s2 + $0x8] sm:$0xff]  }
   0x2   :  { %497 = vmatprep.subr.bf16.mxu0 %v543_v0  ;;  %513 = vmatprep.mubr.msk.bf16.mxu0 %vm544_vm0, %v543_v0  ;;  %v522_v4 = vld [vmem:[%s731_s2] sm:$0xff]   ;;  %v45_v6 = vld [vmem:[%s732_s1 + $0x8] sm:$0xff]  ;;  %v523_v31 = vld [vmem:[%s735_s6 + $0x18] sm:$0xff]  }
   0x3   :  { %474 = vmatpush3.bf16.msra.mxu1 %v519_v1  ;;  %v44_v5 = vld [vmem:[%s732_s1] sm:$0xff]  ;;  %v43_v15 = vld [vmem:[%s734_s0 + $0x8] sm:$0xff]  ;;  %v524_v32 = vld [vmem:[%s735_s6 + $0x10] sm:$0xff]  }
   0x4   :  { %475 = vmatprep.subr.bf16.mxu1 %v543_v0  ;;  %v46_v7 = vpack.c.bf16 %v45_v6, %v44_v5  ;;  %v429_v8 = vld [vmem:[%s733_s3] ss:$0 sm:$0xff]  ;;  %v525_v33 = vld [vmem:[%s735_s6 + $0x8] sm:$0xff]   ;;  %v527_v35 = vld [vmem:[%s736_s8 + $0x38] sm:$0xff]  }
   0x5   :  { %v42_v10 = vld [vmem:[%s734_s0] sm:$0xff]  ;;  %498 = vmatpush3.bf16.msra.mxu0 %v527_v35  ;;  %v528_v36 = vld [vmem:[%s736_s8 + $0x30] sm:$0xff]   ;;  %v529_v37 = vld [vmem:[%s736_s8 + $0x28] sm:$0xff]  }
   0x6   :  { %v526_v34 = vld [vmem:[%s735_s6] sm:$0xff]   ;;  %499 = vmatprep.subr.bf16.mxu0 %v543_v0  ;;  %v531_v39 = vld [vmem:[%s736_s8 + $0x18] sm:$0xff]   ;;  %v532_v57 = vld [vmem:[%s736_s8 + $0x10] sm:$0xff]  }
   0x7   :  { %476 = vmatpush3.bf16.msra.mxu1 %v520_v2  ;;  %v530_v38 = vld [vmem:[%s736_s8 + $0x20] sm:$0xff]   ;;  %v533_v58 = vld [vmem:[%s736_s8 + $0x8] sm:$0xff]  }
   0x8   :  { %477 = vmatprep.subr.bf16.mxu1 %v543_v0  ;;  %v435_v48 = vld [vmem:[%s737_s4] ss:$0 sm:$0xff] }
   0x9   :  { %500 = vmatpush3.bf16.msra.mxu0 %v528_v36  ;;  %v436_v52 = vld [vmem:[%s738_s5] ss:$0 sm:$0xff] }
   0xa   :  { %501 = vmatprep.subr.bf16.mxu0 %v543_v0  ;;  %v534_v59 = vld [vmem:[%s736_s8] sm:$0xff]  }
   0xb   :  { %478 = vmatpush3.bf16.msra.mxu1 %v521_v3  ;;  %v437_v60 = vld [vmem:[%s739_s7] ss:$0 sm:$0xff] }
   0xc   :  { %479 = vmatprep.subr.bf16.mxu1 %v543_v0  ;;  %v453_v36 = vld [vmem:[%s742_s11] ss:$0 sm:$0xff] }
   0xd   :  { %502 = vmatpush3.bf16.msra.mxu0 %v529_v37 }
   0xe   :  { %503 = vmatprep.subr.bf16.mxu0 %v543_v0 }
   0xf   :  { %480 = vmatpush3.bf16.msra.mxu1 %v522_v4 }
  0x10   :  { %485 = vmatprep.subr.bf16.mxu1 %v543_v0 }
  0x11   :  { %504 = vmatpush3.bf16.msra.mxu0 %v530_v38 }
  0x12   :  { %482 = vmatmul.mubr.msk.bf16.vlgmr.msra.gmra.mxu1 %vm86_vm1, %v46_v7  ;;  %505 = vmatprep.subr.bf16.mxu0 %v543_v0 }
  0x13   :  { %493 = vmatprep.mubr.msk.bf16.mxu1 %vm544_vm0, %v543_v0  ;;  %486 = vmatpush3.bf16.msra.mxu1 %v523_v31 }
  0x14   :  { %487 = vmatprep.subr.bf16.mxu1 %v543_v0 }
  0x15   :  { %506 = vmatpush3.bf16.msra.mxu0 %v531_v39 }
  0x16   :  { %507 = vmatprep.subr.bf16.mxu0 %v543_v0 }
  0x17   :  { %488 = vmatpush3.bf16.msra.mxu1 %v524_v32 }
  0x18   :  { %489 = vmatprep.subr.bf16.mxu1 %v543_v0 }
  0x19   :  { %508 = vmatpush3.bf16.msra.mxu0 %v532_v57 }
  0x1a   :  { %509 = vmatprep.subr.bf16.mxu0 %v543_v0 }
  0x1b   :  { %490 = vmatpush3.bf16.msra.mxu1 %v525_v33 }
  0x1c   :  { %491 = vmatprep.subr.bf16.mxu1 %v543_v0 }
  0x1d   :  { %510 = vmatpush3.bf16.msra.mxu0 %v533_v58 }
  0x1e   :  { %511 = vmatprep.subr.bf16.mxu0 %v543_v0  ;;  %v443_v0 = vld [vmem:[%s740_s9] ss:$0 sm:$0xff] }
  0x1f   :  { %492 = vmatpush3.bf16.msra.mxu1 %v526_v34  ;;  %v452_v34 = vld [vmem:[%s741_s10] ss:$0 sm:$0xff] }
  0x21   :  { %512 = vmatpush3.bf16.msra.mxu0 %v534_v59 }
  0xd2   :  { %v124_v9 = vpop.f32.mrf.mxu1 }
  0xd3   :  { %v125_v11 = vadd.f32 %v429_v8, %v124_v9 }
  0xd4   :  { %v483_v12 = vpop.f32.mrf.mxu1 }
  0xd5   :  { %v131_v13 = vadd.f32 %v125_v11, %v42_v10 }
  0xd6   :  { %v127_v14 = vpop.f32.mrf.mxu1 }
  0xd7   :  { %v128_v16 = vadd.f32 %v429_v8, %v127_v14  ;;  %v135_v17 = vsel %vm86_vm1, %v131_v13, 0.0 }
  0xd8   :  { %v484_v18 = vpop.f32.mrf.mxu1  ;;  %136 = vadd.xlane.f32.xlu0 %v135_v17 }
  0xd9   :  { %v132_v19 = vadd.f32 %v128_v16, %v43_v15 }
  0xdb   :  { %v138_v20 = vsel %vm86_vm1, %v132_v19, 0.0 }
  0xdc   :  { %139 = vadd.xlane.f32.xlu0 %v138_v20 }
 0x161   :  { %v137_v21 = vpop.xlane.xlu0 %136 }
 0x162   :  { %v142_v22 = vmul.f32 0.015625, %v137_v21 }
 0x164   :  { %v144_v23 = vsub.f32 %v131_v13, %v142_v22 }
 0x165   :  { %v140_v24 = vpop.xlane.xlu0 %139 }
 0x166   :  { %v143_v25 = vmul.f32 0.015625, %v140_v24  ;;  %v146_v26 = vmul.f32 %v144_v23, %v144_v23 }
 0x168   :  { %v145_v27 = vsub.f32 %v132_v19, %v143_v25  ;;  %v148_v28 = vsel %vm86_vm1, %v146_v26, 0.0 }
 0x169   :  { %149 = vadd.xlane.f32.xlu1 %v148_v28 }
 0x16a   :  { %v147_v29 = vmul.f32 %v145_v27, %v145_v27 }
 0x16c   :  { %v151_v30 = vsel %vm86_vm1, %v147_v29, 0.0 }
 0x16d   :  { %152 = vadd.xlane.f32.xlu1 %v151_v30 }
 0x1f2   :  { %v150_v40 = vpop.xlane.xlu1 %149 }
 0x1f3   :  { %v154_v41 = vmul.f32 0.015625, %v150_v40 }
 0x1f5   :  { %v156_v42 = vadd.f32 1e-05, %v154_v41 }
 0x1f6   :  { %v153_v43 = vpop.xlane.xlu1 %152 }
 0x1f7   :  { %535 = vrsqrt.f32 %v156_v42  ;;  %v155_v44 = vmul.f32 0.015625, %v153_v43 }
 0x1f9   :  { %v157_v45 = vadd.f32 1e-05, %v155_v44 }
 0x1fb   :  { %537 = vrsqrt.f32 %v157_v45 }
 0x204   :  { %v536_v46 = vpop.eup %535 }
 0x205   :  { %v160_v47 = vmul.f32 %v536_v46, %v144_v23 }
 0x207   :  { %v168_v51 = vmul.f32 %v435_v48, %v160_v47 }
 0x208   :  { %v538_v49 = vpop.eup %537 }
 0x209   :  { %v161_v50 = vmul.f32 %v538_v49, %v145_v27  ;;  %v176_v54 = vadd.f32 %v436_v52, %v168_v51 }
 0x20b   :  { %v169_v53 = vmul.f32 %v435_v48, %v161_v50 }
 0x20d   :  { %v177_v55 = vadd.f32 %v436_v52, %v169_v53 }
 0x20f   :  { %v178_v56 = vpack.c.bf16 %v177_v55, %v176_v54 }
 0x211   :  { %494 = vmatmul.mubr.msk.bf16.vlgmr.msra.gmra.mxu1 %vm86_vm1, %v178_v56 }
 0x2d1   :  { %v255_v61 = vpop.f32.mrf.mxu1 }
 0x2d2   :  { %v256_v63 = vadd.f32 %v437_v60, %v255_v61 }
 0x2d3   :  { %v495_v62 = vpop.f32.mrf.mxu1 }
 0x2d4   :  { %v262_v4 = vmax.f32 %v256_v63, 0.0 }
 0x2d5   :  { %v258_v1 = vpop.f32.mrf.mxu1 }
 0x2d6   :  { %v259_v2 = vadd.f32 %v437_v60, %v258_v1 }
 0x2d7   :  { %v496_v3 = vpop.f32.mrf.mxu1 }
 0x2d8   :  { %v263_v5 = vmax.f32 %v259_v2, 0.0 }
 0x2da   :  { %v264_v6 = vpack.c.bf16 %v263_v5, %v262_v4 }
 0x2dc   :  { %514 = vmatmul.mubr.bf16.vlgmr.msra.gmra.mxu0 %v264_v6 }
 0x39c   :  { %v370_v7 = vpop.f32.mrf.mxu0 }
 0x39d   :  { %v371_v8 = vadd.f32 %v443_v0, %v370_v7 }
 0x39e   :  { %v515_v9 = vpop.f32.mrf.mxu0 }
 0x39f   :  { %v377_v10 = vadd.f32 %v371_v8, %v176_v54 }
 0x3a0   :  { %v373_v11 = vpop.f32.mrf.mxu0 }
 0x3a1   :  { %v374_v12 = vadd.f32 %v443_v0, %v373_v11  ;;  %v381_v13 = vsel %vm86_vm1, %v377_v10, 0.0 }
 0x3a2   :  { %382 = vadd.xlane.f32.xlu0 %v381_v13  ;;  %v516_v14 = vpop.f32.mrf.mxu0 }
 0x3a3   :  { %v378_v15 = vadd.f32 %v374_v12, %v177_v55 }
 0x3a5   :  { %v384_v16 = vsel %vm86_vm1, %v378_v15, 0.0 }
 0x3a6   :  { %385 = vadd.xlane.f32.xlu1 %v384_v16 }
 0x42b   :  { %v383_v17 = vpop.xlane.xlu0 %382 }
 0x42c   :  { %v387_v18 = vmul.f32 0.015625, %v383_v17 }
 0x42e   :  { %v389_v19 = vsub.f32 %v377_v10, %v387_v18 }
 0x42f   :  { %v386_v20 = vpop.xlane.xlu1 %385 }
 0x430   :  { %v388_v21 = vmul.f32 0.015625, %v386_v20  ;;  %v391_v22 = vmul.f32 %v389_v19, %v389_v19 }
 0x432   :  { %v390_v23 = vsub.f32 %v378_v15, %v388_v21  ;;  %v393_v24 = vsel %vm86_vm1, %v391_v22, 0.0 }
 0x433   :  { %394 = vadd.xlane.f32.xlu0 %v393_v24 }
 0x434   :  { %v392_v25 = vmul.f32 %v390_v23, %v390_v23 }
 0x436   :  { %v396_v26 = vsel %vm86_vm1, %v392_v25, 0.0 }
 0x437   :  { %397 = vadd.xlane.f32.xlu1 %v396_v26 }
 0x4bc   :  { %v395_v27 = vpop.xlane.xlu0 %394 }
 0x4bd   :  { %v399_v28 = vmul.f32 0.015625, %v395_v27 }
 0x4bf   :  { %v401_v29 = vadd.f32 1e-05, %v399_v28 }
 0x4c0   :  { %v398_v30 = vpop.xlane.xlu1 %397 }
 0x4c1   :  { %539 = vrsqrt.f32 %v401_v29  ;;  %v400_v31 = vmul.f32 0.015625, %v398_v30 }
 0x4c3   :  { %v402_v32 = vadd.f32 1e-05, %v400_v31 }
 0x4c5   :  { %541 = vrsqrt.f32 %v402_v32 }
 0x4ce   :  { %v540_v33 = vpop.eup %539 }
 0x4cf   :  { %v405_v35 = vmul.f32 %v540_v33, %v389_v19 }
 0x4d1   :  { %v413_v37 = vmul.f32 %v452_v34, %v405_v35 }
 0x4d2   :  { %v542_v38 = vpop.eup %541 }
 0x4d3   :  { %v421_v39 = vadd.f32 %v453_v36, %v413_v37  ;;  %v406_v40 = vmul.f32 %v542_v38, %v390_v23 }
 0x4d5   :  { %423 = vst.msk [vmem:[%s743_s12] sm:$0xff] %vm86_vm1, %v421_v39  ;;  %v414_v41 = vmul.f32 %v452_v34, %v406_v40 }
 0x4d7   :  { %v422_v42 = vadd.f32 %v453_v36, %v414_v41 }
 0x4d9   :  { %424 = vst.msk [vmem:[%s743_s12 + $0x8] sm:$0xff] %vm86_vm1, %v422_v42 }

</bundles_post_ra>
